<compile_context>
chip_gen: v7x
topology: tpu7x:2x2x1
jax: 0.10.0
libtpu: 0.0.40
codegen_flags: <defaults>
</compile_context>

<pallas_src>
import jax
import jax.numpy as jnp
from jax.experimental import pallas as pl
from jax.experimental.pallas import tpu as pltpu


def _round_up(x, m):
    return ((x + m - 1) // m) * m


# -----------------------------------------------------------------------------
# Fused kernel: 5 x (matmul + bias + ReLU)  +  final matmul + bias
# -----------------------------------------------------------------------------
def _pointnet_fused_kernel(x_ref,
                           w1, w2, w3, w4, w5, w6,
                           b1, b2, b3, b4, b5, b6,
                           o_ref):
    def dense(h, w_ref, b_ref, relu):
        # Cast activations to the weight dtype (bf16 for all but the first
        # layer); accumulate in f32 on the MXU.
        y = jnp.dot(h.astype(w_ref.dtype), w_ref[...],
                    preferred_element_type=jnp.float32)
        y = y + b_ref[...]
        return jnp.maximum(y, 0.0) if relu else y

    h = x_ref[...]                       # (tm, 6)    f32
    h = dense(h, w1, b1, True)           # (tm, 64)
    h = dense(h, w2, b2, True)           # (tm, 128)
    h = dense(h, w3, b3, True)           # (tm, 1024)
    h = dense(h, w4, b4, True)           # (tm, 512)
    h = dense(h, w5, b5, True)           # (tm, 256)
    o_ref[...] = dense(h, w6, b6, False).astype(o_ref.dtype)   # (tm, 128) lane-dense


# -----------------------------------------------------------------------------
# Parameter construction / folding
# -----------------------------------------------------------------------------
def init_pointnet_params(key, num_classes):
    """Deterministic synthetic parameters matching the PyTorch shapes (f32)."""
    dims = [6, 64, 128, 1024, 512, 256]  # mlp1..mlp5 channel sizes
    eps = 1e-5
    mlp_params = []
    for i in range(5):
        cin, cout = dims[i], dims[i + 1]
        key, k1, k2, k3, k4, k5, k6 = jax.random.split(key, 7)
        # Conv1d(cin, cout, 1) weight is (cout, cin, 1); stored transposed as (cin, cout).
        w = jax.random.normal(k1, (cin, cout), jnp.float32) / jnp.sqrt(cin)
        b = 0.1 * jax.random.normal(k2, (1, cout), jnp.float32)
        gamma = 1.0 + 0.1 * jax.random.normal(k3, (1, cout), jnp.float32)
        beta = 0.1 * jax.random.normal(k4, (1, cout), jnp.float32)
        r_mean = 0.1 * jax.random.normal(k5, (1, cout), jnp.float32)
        r_var = 1.0 + jnp.abs(jax.random.normal(k6, (1, cout), jnp.float32))
        scale = gamma / jnp.sqrt(r_var + eps)
        shift = beta - r_mean * scale
        mlp_params.append((w, b, scale, shift))
    key, k1, k2 = jax.random.split(key, 3)
    wf = jax.random.normal(k1, (256, num_classes), jnp.float32) / 16.0
    bf = 0.1 * jax.random.normal(k2, (1, num_classes), jnp.float32)
    return mlp_params, (wf, bf)


def fold_pointnet_params(mlp_params, fc_params, lane_pad=128):
    """Fold each layer's (eval-mode) BN affine into the NEXT layer's W/b.

    Since z = relu(x@W_l + b_l) * s_l + t_l and the next op is linear,
        (z*s_l + t_l) @ W_{l+1} + b_{l+1}
          = z @ (diag(s_l) W_{l+1}) + (b_{l+1} + t_l @ W_{l+1})
    so the kernel only ever sees matmul + bias (+ ReLU).

    Returns (weights, biases, num_classes) where weights[1:] are bf16,
    weights[0] is f32 (6-wide input layer) and the FC weight/bias are
    zero-padded to `lane_pad` output lanes for lane-dense stores.
    """
    ws, bs = [], []
    prev_scale, prev_shift = None, None
    for idx, (w, b, scale, shift) in enumerate(mlp_params):
        if prev_scale is None:
            w_f, b_f = w, b
        else:
            w_f = w * prev_scale.T            # diag(scale_prev) @ W
            b_f = b + prev_shift @ w          # (1,cin) @ (cin,cout)
        ws.append(w_f.astype(jnp.float32 if idx == 0 else jnp.bfloat16))
        bs.append(b_f.astype(jnp.float32))
        prev_scale, prev_shift = scale, shift

    wf, bf = fc_params
    wf_f = wf * prev_scale.T
    bf_f = bf + prev_shift @ wf
    num_classes = wf.shape[1]
    padded = _round_up(max(num_classes, lane_pad), lane_pad)
    wf_f = jnp.pad(wf_f, ((0, 0), (0, padded - num_classes)))
    bf_f = jnp.pad(bf_f, ((0, 0), (0, padded - num_classes)))
    ws.append(wf_f.astype(jnp.bfloat16))
    bs.append(bf_f.astype(jnp.float32))
    return ws, bs, num_classes


# -----------------------------------------------------------------------------
# Forward pass
# -----------------------------------------------------------------------------
def pointnet_forward(x, folded_ws, folded_bs, num_classes, tm=1024):
    """x: (B, N, 6) — same tensor PyTorch's forward receives before its permute."""
    B, N, C = x.shape
    M = B * N
    h = x.reshape(M, C).astype(jnp.float32)   # permute(0,2,1) is just a layout choice

    # Row tiling: multiple of 16 (bf16 sublane packing), capped at tm;
    # pad M up to the tile instead of asserting.
    tm_eff = min(tm, _round_up(M, 16))
    Mp = _round_up(M, tm_eff)
    if Mp != M:
        h = jnp.pad(h, ((0, Mp - M), (0, 0)))

    cout_padded = folded_ws[-1].shape[1]      # lane-dense (e.g. 128)
    grid = (Mp // tm_eff,)

    in_specs = [pl.BlockSpec((tm_eff, C), lambda i: (i, 0))]
    in_specs += [pl.BlockSpec(w.shape, lambda i: (0, 0)) for w in folded_ws]
    in_specs += [pl.BlockSpec(b.shape, lambda i: (0, 0)) for b in folded_bs]

    out = pl.pallas_call(
        _pointnet_fused_kernel,
        out_shape=jax.ShapeDtypeStruct((Mp, cout_padded), jnp.float32),
        grid_spec=pltpu.PrefetchScalarGridSpec(
            num_scalar_prefetch=0,
            grid=grid,
            in_specs=in_specs,
            out_specs=pl.BlockSpec((tm_eff, cout_padded), lambda i: (i, 0)),
        ),
        compiler_params=pltpu.CompilerParams(
            dimension_semantics=("parallel",),          # megacore row sharding (v7x)
            vmem_limit_bytes=48 * 1024 * 1024,          # fits v5e/v6e/v7x budgets
        ),
    )(h, *folded_ws, *folded_bs)

    return out[:M, :num_classes].reshape(B, N, num_classes)


def pointnet_reference(x, mlp_params, fc_params):
    """Pure-JAX f32 reference with the original (un-folded) layer semantics."""
    B, N, C = x.shape
    h = x.reshape(B * N, C)
    for (w, b, scale, shift) in mlp_params:
        h = jnp.maximum(h @ w + b, 0.0) * scale + shift   # Conv1d(k=1) -> ReLU -> BN(eval)
    wf, bf = fc_params
    return (h @ wf + bf).reshape(B, N, wf.shape[1])


if __name__ == "__main__":
    key = jax.random.PRNGKey(0)
    kx, kp = jax.random.split(key)
    B, N, num_classes = 2, 16, 10
    x = jax.random.normal(kx, (B, N, 6), jnp.float32)

    mlp_params, fc_params = init_pointnet_params(kp, num_classes)
    folded_ws, folded_bs, ncls = fold_pointnet_params(mlp_params, fc_params)

    out = pointnet_forward(x, folded_ws, folded_bs, ncls)
    out = jax.block_until_ready(out)
    assert out.shape == (B, N, num_classes), out.shape

    ref = pointnet_reference(x, mlp_params, fc_params)
    max_err = float(jnp.max(jnp.abs(out - ref)))
    assert jnp.allclose(out, ref, atol=5e-2, rtol=5e-2), (
        f"mismatch vs reference (max abs err {max_err})")
    print("KERNEL_OK")
</pallas_src>

<mosaic_0001>
module attributes {stable_mosaic.version = 11 : i64} {
  func.func @_pointnet_fused_kernel(%arg0: i32, %arg1: memref<32x6xf32, #tpu.memory_space<vmem>>, %arg2: memref<6x64xf32, #tpu.memory_space<vmem>>, %arg3: memref<64x128xbf16, #tpu.memory_space<vmem>>, %arg4: memref<128x1024xbf16, #tpu.memory_space<vmem>>, %arg5: memref<1024x512xbf16, #tpu.memory_space<vmem>>, %arg6: memref<512x256xbf16, #tpu.memory_space<vmem>>, %arg7: memref<256x128xbf16, #tpu.memory_space<vmem>>, %arg8: memref<1x64xf32, #tpu.memory_space<vmem>>, %arg9: memref<1x128xf32, #tpu.memory_space<vmem>>, %arg10: memref<1x1024xf32, #tpu.memory_space<vmem>>, %arg11: memref<1x512xf32, #tpu.memory_space<vmem>>, %arg12: memref<1x256xf32, #tpu.memory_space<vmem>>, %arg13: memref<1x128xf32, #tpu.memory_space<vmem>>, %arg14: memref<32x128xf32, #tpu.memory_space<vmem>>) attributes {dimension_semantics = [#tpu.dimension_semantics<parallel>], iteration_bounds = array<i64: 1>, scalar_prefetch = 0 : i64, scratch_operands = 0 : i64, tpu.core_type = #tpu.core_type<tc>, window_params = [{transform_indices = @transform_0, window_bounds = array<i64: 32, 6>}, {pipeline_mode = #tpu.pipeline_mode<synchronous>, transform_indices = @transform_1, window_bounds = array<i64: 6, 64>}, {pipeline_mode = #tpu.pipeline_mode<synchronous>, transform_indices = @transform_2, window_bounds = array<i64: 64, 128>}, {pipeline_mode = #tpu.pipeline_mode<synchronous>, transform_indices = @transform_3, window_bounds = array<i64: 128, 1024>}, {pipeline_mode = #tpu.pipeline_mode<synchronous>, transform_indices = @transform_4, window_bounds = array<i64: 1024, 512>}, {pipeline_mode = #tpu.pipeline_mode<synchronous>, transform_indices = @transform_5, window_bounds = array<i64: 512, 256>}, {pipeline_mode = #tpu.pipeline_mode<synchronous>, transform_indices = @transform_6, window_bounds = array<i64: 256, 128>}, {pipeline_mode = #tpu.pipeline_mode<synchronous>, transform_indices = @transform_7, window_bounds = array<i64: 1, 64>}, {pipeline_mode = #tpu.pipeline_mode<synchronous>, transform_indices = @transform_8, window_bounds = array<i64: 1, 128>}, {pipeline_mode = #tpu.pipeline_mode<synchronous>, transform_indices = @transform_9, window_bounds = array<i64: 1, 1024>}, {pipeline_mode = #tpu.pipeline_mode<synchronous>, transform_indices = @transform_10, window_bounds = array<i64: 1, 512>}, {pipeline_mode = #tpu.pipeline_mode<synchronous>, transform_indices = @transform_11, window_bounds = array<i64: 1, 256>}, {pipeline_mode = #tpu.pipeline_mode<synchronous>, transform_indices = @transform_12, window_bounds = array<i64: 1, 128>}, {transform_indices = @transform_13, window_bounds = array<i64: 32, 128>}]} {
    %c0 = arith.constant 0 : index
    %c0_0 = arith.constant 0 : index
    %0 = vector.load %arg1[%c0, %c0_0] : memref<32x6xf32, #tpu.memory_space<vmem>>, vector<32x6xf32>
    %c0_1 = arith.constant 0 : index
    %c0_2 = arith.constant 0 : index
    %1 = vector.load %arg2[%c0_1, %c0_2] : memref<6x64xf32, #tpu.memory_space<vmem>>, vector<6x64xf32>
    %cst = arith.constant dense<0.000000e+00> : vector<32x64xf32>
    %2 = tpu.matmul %0, %1, %cst {dimension_numbers = #tpu.dot_dimension_numbers<[1], [0], [0], [1], [0, 0, 1, 1], [], []>} : vector<32x6xf32>, vector<6x64xf32>, vector<32x64xf32> -> vector<32x64xf32>
    %c0_3 = arith.constant 0 : index
    %c0_4 = arith.constant 0 : index
    %3 = vector.load %arg8[%c0_3, %c0_4] : memref<1x64xf32, #tpu.memory_space<vmem>>, vector<1x64xf32>
    %4 = vector.broadcast %3 : vector<1x64xf32> to vector<32x64xf32>
    %5 = arith.addf %2, %4 : vector<32x64xf32>
    %cst_5 = arith.constant 0.000000e+00 : f32
    %6 = vector.broadcast %cst_5 : f32 to vector<32x64xf32>
    %7 = arith.maximumf %5, %6 : vector<32x64xf32>
    %8 = arith.truncf %7 : vector<32x64xf32> to vector<32x64xbf16>
    %c0_6 = arith.constant 0 : index
    %c0_7 = arith.constant 0 : index
    %9 = vector.load %arg3[%c0_6, %c0_7] : memref<64x128xbf16, #tpu.memory_space<vmem>>, vector<64x128xbf16>
    %cst_8 = arith.constant dense<0.000000e+00> : vector<32x128xf32>
    %10 = tpu.matmul %8, %9, %cst_8 {dimension_numbers = #tpu.dot_dimension_numbers<[1], [0], [0], [1], [0, 0, 1, 1], [], []>} : vector<32x64xbf16>, vector<64x128xbf16>, vector<32x128xf32> -> vector<32x128xf32>
    %c0_9 = arith.constant 0 : index
    %c0_10 = arith.constant 0 : index
    %11 = vector.load %arg9[%c0_9, %c0_10] : memref<1x128xf32, #tpu.memory_space<vmem>>, vector<1x128xf32>
    %12 = vector.broadcast %11 : vector<1x128xf32> to vector<32x128xf32>
    %13 = arith.addf %10, %12 : vector<32x128xf32>
    %cst_11 = arith.constant 0.000000e+00 : f32
    %14 = vector.broadcast %cst_11 : f32 to vector<32x128xf32>
    %15 = arith.maximumf %13, %14 : vector<32x128xf32>
    %16 = arith.truncf %15 : vector<32x128xf32> to vector<32x128xbf16>
    %c0_12 = arith.constant 0 : index
    %c0_13 = arith.constant 0 : index
    %17 = vector.load %arg4[%c0_12, %c0_13] : memref<128x1024xbf16, #tpu.memory_space<vmem>>, vector<128x1024xbf16>
    %cst_14 = arith.constant dense<0.000000e+00> : vector<32x1024xf32>
    %18 = tpu.matmul %16, %17, %cst_14 {dimension_numbers = #tpu.dot_dimension_numbers<[1], [0], [0], [1], [0, 0, 1, 1], [], []>} : vector<32x128xbf16>, vector<128x1024xbf16>, vector<32x1024xf32> -> vector<32x1024xf32>
    %c0_15 = arith.constant 0 : index
    %c0_16 = arith.constant 0 : index
    %19 = vector.load %arg10[%c0_15, %c0_16] : memref<1x1024xf32, #tpu.memory_space<vmem>>, vector<1x1024xf32>
    %20 = vector.broadcast %19 : vector<1x1024xf32> to vector<32x1024xf32>
    %21 = arith.addf %18, %20 : vector<32x1024xf32>
    %cst_17 = arith.constant 0.000000e+00 : f32
    %22 = vector.broadcast %cst_17 : f32 to vector<32x1024xf32>
    %23 = arith.maximumf %21, %22 : vector<32x1024xf32>
    %24 = arith.truncf %23 : vector<32x1024xf32> to vector<32x1024xbf16>
    %c0_18 = arith.constant 0 : index
    %c0_19 = arith.constant 0 : index
    %25 = vector.load %arg5[%c0_18, %c0_19] : memref<1024x512xbf16, #tpu.memory_space<vmem>>, vector<1024x512xbf16>
    %cst_20 = arith.constant dense<0.000000e+00> : vector<32x512xf32>
    %26 = tpu.matmul %24, %25, %cst_20 {dimension_numbers = #tpu.dot_dimension_numbers<[1], [0], [0], [1], [0, 0, 1, 1], [], []>} : vector<32x1024xbf16>, vector<1024x512xbf16>, vector<32x512xf32> -> vector<32x512xf32>
    %c0_21 = arith.constant 0 : index
    %c0_22 = arith.constant 0 : index
    %27 = vector.load %arg11[%c0_21, %c0_22] : memref<1x512xf32, #tpu.memory_space<vmem>>, vector<1x512xf32>
    %28 = vector.broadcast %27 : vector<1x512xf32> to vector<32x512xf32>
    %29 = arith.addf %26, %28 : vector<32x512xf32>
    %cst_23 = arith.constant 0.000000e+00 : f32
    %30 = vector.broadcast %cst_23 : f32 to vector<32x512xf32>
    %31 = arith.maximumf %29, %30 : vector<32x512xf32>
    %32 = arith.truncf %31 : vector<32x512xf32> to vector<32x512xbf16>
    %c0_24 = arith.constant 0 : index
    %c0_25 = arith.constant 0 : index
    %33 = vector.load %arg6[%c0_24, %c0_25] : memref<512x256xbf16, #tpu.memory_space<vmem>>, vector<512x256xbf16>
    %cst_26 = arith.constant dense<0.000000e+00> : vector<32x256xf32>
    %34 = tpu.matmul %32, %33, %cst_26 {dimension_numbers = #tpu.dot_dimension_numbers<[1], [0], [0], [1], [0, 0, 1, 1], [], []>} : vector<32x512xbf16>, vector<512x256xbf16>, vector<32x256xf32> -> vector<32x256xf32>
    %c0_27 = arith.constant 0 : index
    %c0_28 = arith.constant 0 : index
    %35 = vector.load %arg12[%c0_27, %c0_28] : memref<1x256xf32, #tpu.memory_space<vmem>>, vector<1x256xf32>
    %36 = vector.broadcast %35 : vector<1x256xf32> to vector<32x256xf32>
    %37 = arith.addf %34, %36 : vector<32x256xf32>
    %cst_29 = arith.constant 0.000000e+00 : f32
    %38 = vector.broadcast %cst_29 : f32 to vector<32x256xf32>
    %39 = arith.maximumf %37, %38 : vector<32x256xf32>
    %40 = arith.truncf %39 : vector<32x256xf32> to vector<32x256xbf16>
    %c0_30 = arith.constant 0 : index
    %c0_31 = arith.constant 0 : index
    %41 = vector.load %arg7[%c0_30, %c0_31] : memref<256x128xbf16, #tpu.memory_space<vmem>>, vector<256x128xbf16>
    %cst_32 = arith.constant dense<0.000000e+00> : vector<32x128xf32>
    %42 = tpu.matmul %40, %41, %cst_32 {dimension_numbers = #tpu.dot_dimension_numbers<[1], [0], [0], [1], [0, 0, 1, 1], [], []>} : vector<32x256xbf16>, vector<256x128xbf16>, vector<32x128xf32> -> vector<32x128xf32>
    %c0_33 = arith.constant 0 : index
    %c0_34 = arith.constant 0 : index
    %43 = vector.load %arg13[%c0_33, %c0_34] : memref<1x128xf32, #tpu.memory_space<vmem>>, vector<1x128xf32>
    %44 = vector.broadcast %43 : vector<1x128xf32> to vector<32x128xf32>
    %45 = arith.addf %42, %44 : vector<32x128xf32>
    %c0_35 = arith.constant 0 : index
    %c0_36 = arith.constant 0 : index
    %46 = vector.load %arg14[%c0_35, %c0_36] : memref<32x128xf32, #tpu.memory_space<vmem>>, vector<32x128xf32>
    tpu.vector_store %arg14[%c0_35, %c0_36], %45 {strides = array<i32>} : memref<32x128xf32, #tpu.memory_space<vmem>>, vector<32x128xf32>,
    return
  }
  func.func @transform_0(%arg0: i32) -> (i32, i32) {
    %c0_i32 = arith.constant 0 : i32
    %c0_i32_0 = arith.constant 0 : i32
    return %arg0, %c0_i32 : i32, i32
  }
  func.func @transform_1(%arg0: i32) -> (i32, i32) {
    %c0_i32 = arith.constant 0 : i32
    %c0_i32_0 = arith.constant 0 : i32
    %c0_i32_1 = arith.constant 0 : i32
    return %c0_i32, %c0_i32_0 : i32, i32
  }
  func.func @transform_2(%arg0: i32) -> (i32, i32) {
    %c0_i32 = arith.constant 0 : i32
    %c0_i32_0 = arith.constant 0 : i32
    %c0_i32_1 = arith.constant 0 : i32
    return %c0_i32, %c0_i32_0 : i32, i32
  }
  func.func @transform_3(%arg0: i32) -> (i32, i32) {
    %c0_i32 = arith.constant 0 : i32
    %c0_i32_0 = arith.constant 0 : i32
    %c0_i32_1 = arith.constant 0 : i32
    return %c0_i32, %c0_i32_0 : i32, i32
  }
  func.func @transform_4(%arg0: i32) -> (i32, i32) {
    %c0_i32 = arith.constant 0 : i32
    %c0_i32_0 = arith.constant 0 : i32
    %c0_i32_1 = arith.constant 0 : i32
    return %c0_i32, %c0_i32_0 : i32, i32
  }
  func.func @transform_5(%arg0: i32) -> (i32, i32) {
    %c0_i32 = arith.constant 0 : i32
    %c0_i32_0 = arith.constant 0 : i32
    %c0_i32_1 = arith.constant 0 : i32
    return %c0_i32, %c0_i32_0 : i32, i32
  }
  func.func @transform_6(%arg0: i32) -> (i32, i32) {
    %c0_i32 = arith.constant 0 : i32
    %c0_i32_0 = arith.constant 0 : i32
    %c0_i32_1 = arith.constant 0 : i32
    return %c0_i32, %c0_i32_0 : i32, i32
  }
  func.func @transform_7(%arg0: i32) -> (i32, i32) {
    %c0_i32 = arith.constant 0 : i32
    %c0_i32_0 = arith.constant 0 : i32
    %c0_i32_1 = arith.constant 0 : i32
    return %c0_i32, %c0_i32_0 : i32, i32
  }
  func.func @transform_8(%arg0: i32) -> (i32, i32) {
    %c0_i32 = arith.constant 0 : i32
    %c0_i32_0 = arith.constant 0 : i32
    %c0_i32_1 = arith.constant 0 : i32
    return %c0_i32, %c0_i32_0 : i32, i32
  }
  func.func @transform_9(%arg0: i32) -> (i32, i32) {
    %c0_i32 = arith.constant 0 : i32
    %c0_i32_0 = arith.constant 0 : i32
    %c0_i32_1 = arith.constant 0 : i32
    return %c0_i32, %c0_i32_0 : i32, i32
  }
  func.func @transform_10(%arg0: i32) -> (i32, i32) {
    %c0_i32 = arith.constant 0 : i32
    %c0_i32_0 = arith.constant 0 : i32
    %c0_i32_1 = arith.constant 0 : i32
    return %c0_i32, %c0_i32_0 : i32, i32
  }
  func.func @transform_11(%arg0: i32) -> (i32, i32) {
    %c0_i32 = arith.constant 0 : i32
    %c0_i32_0 = arith.constant 0 : i32
    %c0_i32_1 = arith.constant 0 : i32
    return %c0_i32, %c0_i32_0 : i32, i32
  }
  func.func @transform_12(%arg0: i32) -> (i32, i32) {
    %c0_i32 = arith.constant 0 : i32
    %c0_i32_0 = arith.constant 0 : i32
    %c0_i32_1 = arith.constant 0 : i32
    return %c0_i32, %c0_i32_0 : i32, i32
  }
  func.func @transform_13(%arg0: i32) -> (i32, i32) {
    %c0_i32 = arith.constant 0 : i32
    %c0_i32_0 = arith.constant 0 : i32
    return %arg0, %c0_i32 : i32, i32
  }
}

</mosaic_0001>

<bundles_post_ra>
// kernel: tpu_custom_call.1
= control target key start
LH: loop header
LB: loop body
LE: loop exit
PB: predicated region body
PF: predicated region fallthrough
CT: control target
= control target key end

     0   :  { %18 = vsyncpa [#allocation3], 0  ;;  %s5231_s0 = inlined_call_operand.vmem [shape: f32[32,6], index: 0, kind: input, shape index: {}]   ;;  %s5232_s1 = inlined_call_operand.vmem [shape: f32[6,64], index: 1, kind: input, shape index: {}]   ;;  %s5233_s2 = inlined_call_operand.vmem [shape: bf16[64,128], index: 2, kind: input, shape index: {}]   ;;  %s5234_s3 = inlined_call_operand.hbm [shape: bf16[128,1024], index: 3, kind: input, shape index: {}]   ;;  %s5235_s4 = inlined_call_operand.hbm [shape: bf16[1024,512], index: 4, kind: input, shape index: {}]   ;;  %s5236_s5 = inlined_call_operand.hbm [shape: bf16[512,256], index: 5, kind: input, shape index: {}]   ;;  %s5237_s6 = inlined_call_operand.hbm [shape: bf16[256,128], index: 6, kind: input, shape index: {}]   ;;  %s5238_s7 = inlined_call_operand.vmem [shape: f32[1,64], index: 7, kind: input, shape index: {}]   ;;  %s5239_s8 = inlined_call_operand.vmem [shape: f32[1,128], index: 8, kind: input, shape index: {}]   ;;  %s5240_s9 = inlined_call_operand.vmem [shape: f32[1,1024], index: 9, kind: input, shape index: {}]   ;;  %s5241_s10 = inlined_call_operand.vmem [shape: f32[1,512], index: 10, kind: input, shape index: {}]   ;;  %s5242_s11 = inlined_call_operand.vmem [shape: f32[1,256], index: 11, kind: input, shape index: {}]   ;;  %s5243_s12 = inlined_call_operand.vmem [shape: f32[1,128], index: 12, kind: input, shape index: {}]   ;;  %s5244_s13 = inlined_call_operand.hbm [shape: f32[32,128], index: 13, kind: output, shape index: {}]  }
   0x1   :  { %19 = vsyncpa [#allocation6], 0 }
   0x2   :  { %20 = vsyncpa [#allocation9], 0 }
   0x3   :  { %21 = vsyncpa [#allocation4], 0  ;;  %s4920_s25 = smov [#allocation5]   ;;  %s4802_s29 = scalar_lea.hbm %s5235_s4, 32768 }
   0x4   :  { %s45_s26 = sshll.u32 %s4920_s25, 4  ;;  %p4803_p0 = scmp.ne.s32.totalorder %s5235_s4, %s4802_s29  ;;  %s46_s26 = int_to_ptr.vmem [resolvable:$true] %s45_s26 }
   0x5   :  { %p4806_p1 = scmp.lt.u32.totalorder %s4802_s29, %s5235_s4 }
   0x7   :  { %p4808_p2 = pnand %p4806_p1, %p4803_p0 }
   0x9   :  { %4811 = shalt.err (!%p4808_p2)
}
   0xa   :  { %s4812_s17 = scalar_lea.vmem %s46_s26, 32768  ;;  %p4817_p4 = scmp.lt.s32.totalorder %s46_s26, %s46_s26 }
   0xb   :  { %p4813_p3 = scmp.ne.s32.totalorder %s46_s26, %s4812_s17  ;;  %p4818_p5 = scmp.lt.s32.totalorder %s4812_s17, %s4812_s17 }
   0xd   :  { %p4819_p6 = por %p4818_p5, %p4817_p4 }
   0xf   :  { %p4820_p7 = pnand %p4819_p6, %p4813_p3 }
  0x11   :  { %4823 = shalt.err (!%p4820_p7)
}
  0x12   :  { %s4921_s18 = smov 256   ;;  %s4922_s19 = smov 16  }
  0x13   :  { %51 = dma.hbm_to_vmem [thread:$0]  %s5235_s4, 32768, %s46_s26, [#allocation6], %s4921_s18, %s4921_s18, %s4922_s19  }
  0x14   :  { %s4923_s22 = smov [#allocation2]   ;;  %s4824_s27 = scalar_lea.hbm %s5234_s3, 8192 }
  0x15   :  { %s33_s23 = sshll.u32 %s4923_s22, 4  ;;  %p4825_p8 = scmp.ne.s32.totalorder %s5234_s3, %s4824_s27  ;;  %s34_s23 = int_to_ptr.vmem [resolvable:$true] %s33_s23 }
  0x16   :  { %p4828_p9 = scmp.lt.u32.totalorder %s4824_s27, %s5234_s3 }
  0x18   :  { %p4830_p10 = pnand %p4828_p9, %p4825_p8 }
  0x1a   :  { %4833 = shalt.err (!%p4830_p10)
}
  0x1b   :  { %s4834_s15 = scalar_lea.vmem %s34_s23, 8192  ;;  %p4839_p12 = scmp.lt.s32.totalorder %s34_s23, %s34_s23 }
  0x1c   :  { %p4835_p11 = scmp.ne.s32.totalorder %s34_s23, %s4834_s15  ;;  %p4840_p13 = scmp.lt.s32.totalorder %s4834_s15, %s4834_s15 }
  0x1e   :  { %p4841_p0 = por %p4840_p13, %p4839_p12 }
  0x20   :  { %p4842_p1 = pnand %p4841_p0, %p4835_p11 }
  0x22   :  { %4845 = shalt.err (!%p4842_p1)
}
  0x23   :  { %s4924_s4 = smov 512   ;;  %s4925_s26 = smov 32  }
  0x24   :  { %39 = dma.hbm_to_vmem [thread:$0]  %s5234_s3, 8192, %s34_s23, [#allocation3], %s4924_s4, %s4924_s4, %s4925_s26  }
  0x25   :  { %s4926_s18 = smov [#allocation7]   ;;  %s4846_s22 = scalar_lea.hbm %s5236_s5, 8192 }
  0x26   :  { %s57_s19 = sshll.u32 %s4926_s18, 4  ;;  %p4847_p2 = scmp.ne.s32.totalorder %s5236_s5, %s4846_s22  ;;  %s58_s19 = int_to_ptr.vmem [resolvable:$true] %s57_s19 }
  0x27   :  { %p4850_p3 = scmp.lt.u32.totalorder %s4846_s22, %s5236_s5 }
  0x29   :  { %p4852_p4 = pnand %p4850_p3, %p4847_p2 }
  0x2b   :  { %4855 = shalt.err (!%p4852_p4)
}
  0x2c   :  { %s4856_s29 = scalar_lea.vmem %s58_s19, 8192  ;;  %p4861_p6 = scmp.lt.s32.totalorder %s58_s19, %s58_s19 }
  0x2d   :  { %p4857_p5 = scmp.ne.s32.totalorder %s58_s19, %s4856_s29  ;;  %p4862_p7 = scmp.lt.s32.totalorder %s4856_s29, %s4856_s29 }
  0x2f   :  { %p4863_p8 = por %p4862_p7, %p4861_p6 }
  0x31   :  { %p4864_p9 = pnand %p4863_p8, %p4857_p5 }
  0x33   :  { %4867 = shalt.err (!%p4864_p9)
}
  0x34   :  { %s4927_s3 = smov 128   ;;  %s4928_s23 = smov 8  }
  0x35   :  { %63 = dma.hbm_to_vmem [thread:$0]  %s5236_s5, 8192, %s58_s19, [#allocation6], %s4927_s3, %s4927_s3, %s4928_s23  }
  0x36   :  { %s4929_s15 = smov [#allocation8]   ;;  %s4868_s17 = scalar_lea.hbm %s5237_s6, 2048 }
  0x37   :  { %s69_s4 = sshll.u32 %s4929_s15, 4  ;;  %p4869_p10 = scmp.ne.s32.totalorder %s5237_s6, %s4868_s17  ;;  %s70_s4 = int_to_ptr.vmem [resolvable:$true] %s69_s4 }
  0x38   :  { %p4872_p11 = scmp.lt.u32.totalorder %s4868_s17, %s5237_s6 }
  0x3a   :  { %p4874_p12 = pnand %p4872_p11, %p4869_p10 }
  0x3c   :  { %4877 = shalt.err (!%p4874_p12)
}
  0x3d   :  { %s4878_s24 = scalar_lea.vmem %s70_s4, 2048  ;;  %p4883_p0 = scmp.lt.s32.totalorder %s70_s4, %s70_s4 }
  0x3e   :  { %p4879_p13 = scmp.ne.s32.totalorder %s70_s4, %s4878_s24  ;;  %p4884_p1 = scmp.lt.s32.totalorder %s4878_s24, %s4878_s24 }
  0x40   :  { %p4885_p2 = por %p4884_p1, %p4883_p0 }
  0x42   :  { %p4886_p3 = pnand %p4885_p2, %p4879_p13 }
  0x44   :  { %4889 = shalt.err (!%p4886_p3)
}
  0x45   :  { %s4930_s5 = smov 64   ;;  %s4931_s19 = smov 4  }
  0x46   :  { %75 = dma.hbm_to_vmem [thread:$0]  %s5237_s6, 2048, %s70_s4, [#allocation9], %s4930_s5, %s4930_s5, %s4931_s19  }
  0x47   :  { %4912 = dma.done.wait [#allocation3], 8192  }
  0x48   :  { %4913 = vsyncadd [#allocation3], 4294959104 }
  0x49   :  { %4914 = dma.done.wait [#allocation6], 40960  }
  0x4a   :  { %4915 = vsyncadd [#allocation6], 4294926336 }
  0x4b   :  { %4916 = dma.done.wait [#allocation9], 2048  }
  0x4c   :  { %4917 = vsyncadd [#allocation9], 4294965248  ;;  %vm126_vm0 = vcmask 1045504   ;;  %vm113_vm1 = vcmask 48128   ;;  %v105_v0 = vld [vmem:[%s5232_s1] sm:$0x3f] }
  0x4d   :  { %v101_v1 = vld [vmem:[%s5231_s0] sm:$0xff]  ;;  %v102_v2 = vld [vmem:[%s5231_s0 + $0x8] sm:$0xff]  ;;  %4188 = vmatprep.subr.msk.mxu1 %vm126_vm0, %v105_v0  ;;  %v103_v3 = vld [vmem:[%s5231_s0 + $0x10] sm:$0xff]  ;;  %vm260_vm2 = vcmask 523264   ;;  %s4933_s14 = smov [#allocation10]  }
  0x4e   :  { %4190 = vmatprep.mubr.msk.f32.mxu1 %vm113_vm1, %v101_v1  ;;  %4189 = vmatpush3.msk.msra.mxu1 %vm126_vm0, %v105_v0  ;;  %v104_v4 = vld [vmem:[%s5231_s0 + $0x18] sm:$0xff]  ;;  %v4302_v5 = vld [vmem:[%s5233_s2] sm:$0xff]   ;;  %v4303_v6 = vld [vmem:[%s5233_s2 + $0x8] sm:$0xff]   ;;  %s3721_s15 = sshll.u32 %s4933_s14, 4  ;;  %s3722_s15 = int_to_ptr.vmem [resolvable:$true] %s3721_s15 }
  0x4f   :  { %4191 = vmatmul.mubr.msk.f32.vlgmr.msra.gmra.mrb[0].mxu1 %vm113_vm1, %v102_v2  ;;  %4196 = vmatprep.subr.bf16.mxu1 %v4302_v5  ;;  %v4304_v7 = vld [vmem:[%s5233_s2 + $0x10] sm:$0xff]   ;;  %v4305_v8 = vld [vmem:[%s5233_s2 + $0x18] sm:$0xff]   ;;  %v5082_v9 = vld [vmem:[#allocation2] sm:$0xff]  ;;  %p4895_p5 = scmp.lt.s32.totalorder %s3722_s15, %s3722_s15 }
  0x50   :  { %4193 = vmatprep.mubr.msk.f32.mxu1 %vm113_vm1, %v103_v3  ;;  %4197 = vmatpush3.bf16.msra.mxu1 %v4302_v5  ;;  %v5084_v10 = vld [vmem:[#allocation2 + $0x20] sm:$0xff]  ;;  %v324_v13 = vld [vmem:[#allocation2 + $0x10] sm:$0xff]  ;;  %v3735_v37 = vld [vmem:[%s5238_s7] ss:$0 sm:$0xff] }
  0x51   :  { %4198 = vmatprep.subr.bf16.mxu1 %v4303_v6  ;;  %v3748_v11 = vcombine.low %v5082_v9, %v5084_v10  ;;  %v3749_v12 = vcombine.high %v5082_v9, %v5084_v10  ;;  %v328_v14 = vld [vmem:[#allocation2 + $0x30] sm:$0xff]  ;;  %v330_v50 = vld [vmem:[#allocation2 + $0x40] sm:$0xff] }
  0x52   :  { %v3753_v15 = vcombine.high %v324_v13, %v328_v14  ;;  %v3752_v16 = vcombine.low %v324_v13, %v328_v14  ;;  %v332_v17 = vld [vmem:[#allocation2 + $0x50] sm:$0xff]  ;;  %v334_v51 = vld [vmem:[#allocation2 + $0x60] sm:$0xff] }
  0x53   :  { %4194 = vmatmul.mubr.msk.f32.gmra.mrb[2].mxu1 %vm113_vm1, %v104_v4  ;;  %v336_v18 = vld [vmem:[#allocation2 + $0x70] sm:$0xff]  ;;  %v3757_v54 = vcombine.high %v330_v50, %v334_v51  ;;  %v338_v55 = vld [vmem:[#allocation2 + $0x80] sm:$0xff]  ;;  %v3756_v57 = vcombine.low %v330_v50, %v334_v51 }
  0x54   :  { %4199 = vmatpush3.bf16.msra.mxu1 %v4303_v6  ;;  %854 = vmatprep.subr.bf16.mxu0 %v3753_v15  ;;  %v3761_v19 = vcombine.high %v332_v17, %v336_v18  ;;  %v3760_v20 = vcombine.low %v332_v17, %v336_v18  ;;  %v340_v21 = vld [vmem:[#allocation2 + $0x90] sm:$0xff]  ;;  %v342_v56 = vld [vmem:[#allocation2 + $0xa0] sm:$0xff] }
  0x55   :  { %4200 = vmatprep.subr.bf16.mxu1 %v4304_v7  ;;  %855 = vmatpush1.bf16.msra.mxu0 %v3752_v16  ;;  %v344_v22 = vld [vmem:[#allocation2 + $0xb0] sm:$0xff]  ;;  %v3765_v58 = vcombine.high %v338_v55, %v342_v56  ;;  %v346_v59 = vld [vmem:[#allocation2 + $0xc0] sm:$0xff]  ;;  %v3764_v61 = vcombine.low %v338_v55, %v342_v56  ;;  %v351_v55 = vld [vmem:[#allocation2 + $0xe8] sm:$0xff] }
  0x56   :  { %856 = vmatprep.subr.bf16.mxu0 %v3761_v19  ;;  %v3769_v23 = vcombine.high %v340_v21, %v344_v22  ;;  %v3768_v24 = vcombine.low %v340_v21, %v344_v22  ;;  %v348_v25 = vld [vmem:[#allocation2 + $0xd0] sm:$0xff]  ;;  %v350_v60 = vld [vmem:[#allocation2 + $0xe0] sm:$0xff] }
  0x57   :  { %v352_v26 = vld [vmem:[#allocation2 + $0xf0] sm:$0xff]  ;;  %v3773_v62 = vcombine.high %v346_v59, %v350_v60  ;;  %v354_v63 = vld [vmem:[#allocation2 + $0x100] sm:$0xff]  ;;  %v3772_v1 = vcombine.low %v346_v59, %v350_v60  ;;  %v355_v60 = vld [vmem:[#allocation2 + $0x108] sm:$0xff] }
  0x58   :  { %4201 = vmatpush3.bf16.msra.mxu1 %v4304_v7  ;;  %v3777_v27 = vcombine.high %v348_v25, %v352_v26  ;;  %v3776_v28 = vcombine.low %v348_v25, %v352_v26  ;;  %v356_v29 = vld [vmem:[#allocation2 + $0x110] sm:$0xff]  ;;  %v358_v0 = vld [vmem:[#allocation2 + $0x120] sm:$0xff]  ;;  %v327_v25 = vld [vmem:[#allocation2 + $0x28] sm:$0xff] }
  0x59   :  { %4202 = vmatprep.subr.bf16.mxu1 %v4305_v8  ;;  %857 = vmatpush1.bf16.msra.mxu0 %v3760_v20  ;;  %v360_v30 = vld [vmem:[#allocation2 + $0x130] sm:$0xff]  ;;  %v3781_v2 = vcombine.high %v354_v63, %v358_v0  ;;  %v362_v3 = vld [vmem:[#allocation2 + $0x140] sm:$0xff]  ;;  %v3780_v5 = vcombine.low %v354_v63, %v358_v0 }
  0x5a   :  { %858 = vmatprep.subr.bf16.mxu0 %v3769_v23  ;;  %v3785_v31 = vcombine.high %v356_v29, %v360_v30  ;;  %v3784_v32 = vcombine.low %v356_v29, %v360_v30  ;;  %v364_v33 = vld [vmem:[#allocation2 + $0x150] sm:$0xff]  ;;  %v366_v4 = vld [vmem:[#allocation2 + $0x160] sm:$0xff]  ;;  %v3741_v30 = vld [vmem:[%s5239_s8] ss:$0 sm:$0xff] }
  0x5b   :  { %v368_v34 = vld [vmem:[#allocation2 + $0x170] sm:$0xff]  ;;  %v3789_v6 = vcombine.high %v362_v3, %v366_v4  ;;  %v3788_v7 = vcombine.low %v362_v3, %v366_v4  ;;  %v374_v9 = vld [vmem:[#allocation2 + $0x1a0] sm:$0xff]  ;;  %v367_v3 = vld [vmem:[#allocation2 + $0x168] sm:$0xff] }
  0x5c   :  { %4203 = vmatpush3.bf16.msra.mxu1 %v4305_v8  ;;  %v3793_v35 = vcombine.high %v364_v33, %v368_v34  ;;  %v3792_v36 = vcombine.low %v364_v33, %v368_v34  ;;  %v370_v8 = vld [vmem:[#allocation2 + $0x180] sm:$0xff]  ;;  %v380_v19 = vld [vmem:[#allocation2 + $0x1d0] sm:$0xff] }
  0x5d   :  { %748 = vmatprep.subr.bf16.mxu1 %v3749_v12  ;;  %859 = vmatpush1.bf16.msra.mxu0 %v3768_v24  ;;  %v3797_v10 = vcombine.high %v370_v8, %v374_v9  ;;  %v376_v12 = vld [vmem:[#allocation2 + $0x1b0] sm:$0xff]  ;;  %v3796_v13 = vcombine.low %v370_v8, %v374_v9  ;;  %v378_v16 = vld [vmem:[#allocation2 + $0x1c0] sm:$0xff]  ;;  %v323_v24 = vld [vmem:[#allocation2 + $0x8] sm:$0xff] }
  0x5e   :  { %860 = vmatprep.subr.bf16.mxu0 %v3777_v27  ;;  %v382_v17 = vld [vmem:[#allocation2 + $0x1e0] sm:$0xff]  ;;  %v384_v20 = vld [vmem:[#allocation2 + $0x1f0] sm:$0xff]  ;;  %v3751_v26 = vcombine.high %v323_v24, %v327_v25  ;;  %v3750_v27 = vcombine.low %v323_v24, %v327_v25  ;;  %v371_v8 = vld [vmem:[#allocation2 + $0x188] sm:$0xff] }
  0x5f   :  { %v3805_v18 = vcombine.high %v378_v16, %v382_v17  ;;  %v3804_v21 = vcombine.low %v378_v16, %v382_v17  ;;  %v3809_v22 = vcombine.high %v380_v19, %v384_v20  ;;  %v3808_v23 = vcombine.low %v380_v19, %v384_v20  ;;  %v4308_v29 = vld [vmem:[#allocation5 + $0x4] ss:$16 sps:$4 sm:$0xff]   ;;  %v4306_v50 = vld [vmem:[#allocation5] ss:$16 sps:$4 sm:$0xff]   ;;  %v375_v9 = vld [vmem:[#allocation2 + $0x1a8] sm:$0xff] }
  0x60   :  { %v4314_v51 = vld [vmem:[#allocation5 + $0x24] ss:$16 sps:$4 sm:$0xff]   ;;  %v4312_v56 = vld [vmem:[#allocation5 + $0x20] ss:$16 sps:$4 sm:$0xff]   ;;  %v325_v20 = vld [vmem:[#allocation2 + $0x18] sm:$0xff] }
  0x61   :  { %861 = vmatpush1.bf16.msra.mxu0 %v3776_v28  ;;  %v4932_v28 = vmov 0   ;;  %v4320_v59 = vld [vmem:[#allocation5 + $0x44] ss:$16 sps:$4 sm:$0xff]   ;;  %v4324_v4 = vld [vmem:[#allocation5 + $0x60] ss:$16 sps:$4 sm:$0xff]  }
  0x62   :  { %862 = vmatprep.subr.bf16.mxu0 %v3785_v31  ;;  %886 = vmatprep.mubr.bf16.mxu0 %v4932_v28  ;;  %v4326_v63 = vld [vmem:[#allocation5 + $0x64] ss:$16 sps:$4 sm:$0xff]   ;;  %v4336_v16 = vld [vmem:[#allocation5 + $0xa0] ss:$16 sps:$4 sm:$0xff]  }
  0x63   :  { %v4344_v17 = vld [vmem:[#allocation5 + $0xc4] ss:$16 sps:$4 sm:$0xff]  }
  0x65   :  { %863 = vmatpush1.bf16.msra.mxu0 %v3784_v32 }
  0x66   :  { %864 = vmatprep.subr.bf16.mxu0 %v3793_v35 }
  0x69   :  { %865 = vmatpush1.bf16.msra.mxu0 %v3792_v36 }
 0x122   :  { %v4192_v38 = vpop.f32.mrb[0].mxu1 }
 0x123   :  { %v202_v39 = vadd.f32 %v4192_v38, %v3735_v37  ;;  %v196_v40 = vpop.f32.mrb[1].mxu1 }
 0x124   :  { %v197_v41 = vadd.f32 %v3735_v37, %v196_v40 }
 0x125   :  { %v216_v42 = vmax.f32 %v202_v39, 0.0 }
 0x126   :  { %v215_v43 = vmax.f32 %v197_v41, 0.0  ;;  %v4195_v44 = vpop.f32.mrb[2].mxu1  ;;  %v331_v41 = vld [vmem:[#allocation2 + $0x48] sm:$0xff] }
 0x127   :  { %v212_v45 = vadd.f32 %v4195_v44, %v3735_v37  ;;  %v206_v46 = vpop.f32.mrb[3].mxu1 }
 0x128   :  { %v219_v47 = vpack.c.bf16 %v216_v42, %v215_v43  ;;  %v207_v48 = vadd.f32 %v3735_v37, %v206_v46  ;;  %v335_v42 = vld [vmem:[#allocation2 + $0x68] sm:$0xff] }
 0x129   :  { %v218_v49 = vmax.f32 %v212_v45, 0.0 }
 0x12a   :  { %v217_v52 = vmax.f32 %v207_v48, 0.0  ;;  %4204 = vmatprep.mubr.msk.bf16.mxu1 %vm260_vm2, %v219_v47  ;;  %v3759_v47 = vcombine.high %v331_v41, %v335_v42  ;;  %v339_v48 = vld [vmem:[#allocation2 + $0x88] sm:$0xff] }
 0x12c   :  { %v220_v53 = vpack.c.bf16 %v218_v49, %v217_v52  ;;  %v343_v49 = vld [vmem:[#allocation2 + $0xa8] sm:$0xff]  ;;  %v3758_v52 = vcombine.low %v331_v41, %v335_v42  ;;  %v4360_v41 = vld [vmem:[#allocation5 + $0x120] ss:$16 sps:$4 sm:$0xff]   ;;  %v4368_v42 = vld [vmem:[#allocation5 + $0x144] ss:$16 sps:$4 sm:$0xff]  }
 0x12e   :  { %4205 = vmatmul.mubr.msk.bf16.vlgmr.msra.gmra.mrb[4].mxu1 %vm260_vm2, %v220_v53  ;;  %v3767_v53 = vcombine.high %v339_v48, %v343_v49 }
 0x12f   :  { %749 = vmatpush1.bf16.msra.mxu1 %v3748_v11  ;;  %v372_v11 = vld [vmem:[#allocation2 + $0x190] sm:$0xff]  ;;  %780 = vmatprep.mubr.bf16.mxu1 %v4932_v28 }
 0x130   :  { %750 = vmatprep.subr.bf16.mxu1 %v3757_v54  ;;  %v3801_v14 = vcombine.high %v372_v11, %v376_v12  ;;  %v3800_v15 = vcombine.low %v372_v11, %v376_v12  ;;  %v347_v54 = vld [vmem:[#allocation2 + $0xc8] sm:$0xff]  ;;  %v4338_v11 = vld [vmem:[#allocation5 + $0xa4] ss:$16 sps:$4 sm:$0xff]  }
 0x131   :  { %v3774_v0 = vcombine.low %v347_v54, %v351_v55 }
 0x132   :  { %866 = vmatprep.subr.bf16.mxu0 %v3801_v14  ;;  %v379_v14 = vld [vmem:[#allocation2 + $0x1c8] sm:$0xff] }
 0x133   :  { %751 = vmatpush1.bf16.msra.mxu1 %v3756_v57  ;;  %867 = vmatpush1.bf16.msra.mxu0 %v3800_v15  ;;  %v3766_v57 = vcombine.low %v339_v48, %v343_v49  ;;  %v383_v15 = vld [vmem:[#allocation2 + $0x1e8] sm:$0xff]  ;;  %v361_v48 = vld [vmem:[#allocation2 + $0x138] sm:$0xff]  ;;  %v4366_v49 = vld [vmem:[#allocation5 + $0x140] ss:$16 sps:$4 sm:$0xff]  }
 0x134   :  { %752 = vmatprep.subr.bf16.mxu1 %v3765_v58  ;;  %868 = vmatprep.subr.bf16.mxu0 %v3809_v22  ;;  %v3775_v58 = vcombine.high %v347_v54, %v351_v55  ;;  %v3807_v19 = vcombine.high %v379_v14, %v383_v15  ;;  %v4342_v22 = vld [vmem:[#allocation5 + $0xc0] ss:$16 sps:$4 sm:$0xff]   ;;  %v3806_v24 = vcombine.low %v379_v14, %v383_v15  ;;  %v369_v54 = vld [vmem:[#allocation2 + $0x178] sm:$0xff] }
 0x135   :  { %v4372_v55 = vld [vmem:[#allocation5 + $0x160] ss:$16 sps:$4 sm:$0xff]   ;;  %v4327_v14 = vld [vmem:[#allocation5 + $0x68] ss:$16 sps:$4 sm:$0xff]   ;;  %v4335_v15 = vld [vmem:[#allocation5 + $0x8c] ss:$16 sps:$4 sm:$0xff]  }
 0x137   :  { %753 = vmatpush1.bf16.msra.mxu1 %v3764_v61  ;;  %869 = vmatpush1.bf16.msra.mxu0 %v3808_v23  ;;  %v359_v61 = vld [vmem:[#allocation2 + $0x128] sm:$0xff]  ;;  %v4350_v23 = vld [vmem:[#allocation5 + $0xe4] ss:$16 sps:$4 sm:$0xff]  }
 0x138   :  { %754 = vmatprep.subr.bf16.mxu1 %v3773_v62  ;;  %2566 = vmatprep.subr.bf16.mxu0 %v4308_v29  ;;  %v4318_v62 = vld [vmem:[#allocation5 + $0x40] ss:$16 sps:$4 sm:$0xff]  }
 0x139   :  { %v4348_v29 = vld [vmem:[#allocation5 + $0xe0] ss:$16 sps:$4 sm:$0xff]  }
 0x13b   :  { %755 = vmatpush1.bf16.msra.mxu1 %v3772_v1  ;;  %v3783_v1 = vcombine.high %v355_v60, %v359_v61 }
 0x13c   :  { %756 = vmatprep.subr.bf16.mxu1 %v3781_v2  ;;  %v363_v2 = vld [vmem:[#allocation2 + $0x148] sm:$0xff] }
 0x13d   :  { %v3790_v12 = vcombine.low %v363_v2, %v367_v3 }
 0x13f   :  { %757 = vmatpush1.bf16.msra.mxu1 %v3780_v5  ;;  %v4332_v5 = vld [vmem:[#allocation5 + $0x84] ss:$16 sps:$4 sm:$0xff]  }
 0x140   :  { %758 = vmatprep.subr.bf16.mxu1 %v3789_v6  ;;  %v3782_v6 = vcombine.low %v355_v60, %v359_v61  ;;  %v377_v60 = vld [vmem:[#allocation2 + $0x1b8] sm:$0xff]  ;;  %v4378_v61 = vld [vmem:[#allocation5 + $0x180] ss:$16 sps:$4 sm:$0xff]  }
 0x143   :  { %759 = vmatpush1.bf16.msra.mxu1 %v3788_v7  ;;  %v3791_v7 = vcombine.high %v363_v2, %v367_v3  ;;  %v385_v2 = vld [vmem:[#allocation2 + $0x1f8] sm:$0xff]  ;;  %v4384_v3 = vld [vmem:[#allocation5 + $0x1a0] ss:$16 sps:$4 sm:$0xff]  }
 0x144   :  { %760 = vmatprep.subr.bf16.mxu1 %v3797_v10  ;;  %v4330_v10 = vld [vmem:[#allocation5 + $0x80] ss:$16 sps:$4 sm:$0xff]  }
 0x147   :  { %761 = vmatpush1.bf16.msra.mxu1 %v3796_v13  ;;  %v3799_v13 = vcombine.high %v371_v8, %v375_v9 }
 0x148   :  { %762 = vmatprep.subr.bf16.mxu1 %v3805_v18  ;;  %v3798_v18 = vcombine.low %v371_v8, %v375_v9  ;;  %v4309_v8 = vld [vmem:[#allocation5 + $0x8] ss:$16 sps:$4 sm:$0xff]   ;;  %v4317_v9 = vld [vmem:[#allocation5 + $0x2c] ss:$16 sps:$4 sm:$0xff]  }
 0x14b   :  { %763 = vmatpush1.bf16.msra.mxu1 %v3804_v21  ;;  %v329_v21 = vld [vmem:[#allocation2 + $0x38] sm:$0xff] }
 0x14c   :  { %801 = vmatprep.subr.bf16.mxu1 %v3751_v26  ;;  %v3755_v25 = vcombine.high %v325_v20, %v329_v21  ;;  %v333_v26 = vld [vmem:[#allocation2 + $0x58] sm:$0xff] }
 0x201   :  { %v4206_v31 = vpop.f32.mrb[4].mxu1 }
 0x202   :  { %v310_v32 = vadd.f32 %v4206_v31, %v3741_v30  ;;  %v301_v33 = vpop.f32.mrb[5].mxu1  ;;  %v3754_v31 = vcombine.low %v325_v20, %v329_v21  ;;  %v4390_v20 = vld [vmem:[#allocation5 + $0x1c0] ss:$16 sps:$4 sm:$0xff]   ;;  %v4353_v21 = vld [vmem:[#allocation5 + $0xec] ss:$16 sps:$4 sm:$0xff]  }
 0x203   :  { %v302_v34 = vadd.f32 %v3741_v30, %v301_v33  ;;  %v4207_v35 = vpop.f32.mrb[6].mxu1  ;;  %v341_v33 = vld [vmem:[#allocation2 + $0x98] sm:$0xff] }
 0x204   :  { %v313_v36 = vadd.f32 %v4207_v35, %v3741_v30  ;;  %v304_v37 = vpop.f32.mrb[7].mxu1  ;;  %v318_v39 = vmax.f32 %v310_v32, 0.0  ;;  %v4354_v35 = vld [vmem:[#allocation5 + $0x100] ss:$16 sps:$4 sm:$0xff]  }
 0x205   :  { %v305_v38 = vadd.f32 %v3741_v30, %v304_v37  ;;  %v316_v43 = vmax.f32 %v302_v34, 0.0  ;;  %v4356_v30 = vld [vmem:[#allocation5 + $0x104] ss:$16 sps:$4 sm:$0xff]   ;;  %v345_v34 = vld [vmem:[#allocation2 + $0xb8] sm:$0xff] }
 0x206   :  { %v319_v40 = vmax.f32 %v313_v36, 0.0  ;;  %v4362_v36 = vld [vmem:[#allocation5 + $0x124] ss:$16 sps:$4 sm:$0xff]  }
 0x207   :  { %v317_v44 = vmax.f32 %v305_v38, 0.0  ;;  %v3771_v38 = vcombine.high %v341_v33, %v345_v34 }
 0x208   :  { %v5098_v45 = vpack.c.bf16 %v319_v40, %v318_v39  ;;  %v349_v39 = vld [vmem:[#allocation2 + $0xd8] sm:$0xff] }
 0x209   :  { %v5100_v46 = vpack.c.bf16 %v317_v44, %v316_v43  ;;  %v353_v40 = vld [vmem:[#allocation2 + $0xf8] sm:$0xff]  ;;  %v3770_v43 = vcombine.low %v341_v33, %v345_v34 }
 0x20a   :  { %v3779_v44 = vcombine.high %v349_v39, %v353_v40  ;;  %v4375_v33 = vld [vmem:[#allocation5 + $0x168] ss:$16 sps:$4 sm:$0xff]   ;;  %v4383_v34 = vld [vmem:[#allocation5 + $0x18c] ss:$16 sps:$4 sm:$0xff]  }
 0x20b   :  { %781 = vmatmul.mubr.bf16.vlgmr.msra.gmra.mrb[8].mxu1 %v5100_v46  ;;  %887 = vmatmul.mubr.bf16.vlgmr.msra.gmra.mrb[0].mxu0 %v5100_v46 }
 0x20c   :  { %802 = vmatpush1.bf16.msra.mxu1 %v3750_v27  ;;  %790 = vmatprep.mubr.bf16.mxu1 %v4932_v28  ;;  %v337_v27 = vld [vmem:[#allocation2 + $0x78] sm:$0xff] }
 0x20d   :  { %803 = vmatprep.subr.bf16.mxu1 %v3759_v47  ;;  %896 = vmatprep.mubr.bf16.mxu0 %v4932_v28  ;;  %v3763_v32 = vcombine.high %v333_v26, %v337_v27  ;;  %v3762_v37 = vcombine.low %v333_v26, %v337_v27  ;;  %v357_v47 = vld [vmem:[#allocation2 + $0x118] sm:$0xff] }
 0x20e   :  { %2567 = vmatpush1.bf16.msra.mxu0 %v4306_v50  ;;  %v4374_v50 = vld [vmem:[#allocation5 + $0x164] ss:$16 sps:$4 sm:$0xff]   ;;  %v4357_v26 = vld [vmem:[#allocation5 + $0x108] ss:$16 sps:$4 sm:$0xff]   ;;  %v4365_v27 = vld [vmem:[#allocation5 + $0x12c] ss:$16 sps:$4 sm:$0xff]  }
 0x20f   :  { %2568 = vmatprep.subr.bf16.mxu0 %v4314_v51  ;;  %v3778_v51 = vcombine.low %v349_v39, %v353_v40  ;;  %v4393_v39 = vld [vmem:[#allocation5 + $0x1c8] ss:$16 sps:$4 sm:$0xff]   ;;  %v4401_v40 = vld [vmem:[#allocation5 + $0x1ec] ss:$16 sps:$4 sm:$0xff]  }
 0x210   :  { %804 = vmatpush1.bf16.msra.mxu1 %v3758_v52  ;;  %v3787_v52 = vcombine.high %v357_v47, %v361_v48 }
 0x211   :  { %805 = vmatprep.subr.bf16.mxu1 %v3767_v53  ;;  %v365_v53 = vld [vmem:[#allocation2 + $0x158] sm:$0xff] }
 0x212   :  { %2569 = vmatpush1.bf16.msra.mxu0 %v4312_v56  ;;  %v4380_v56 = vld [vmem:[#allocation5 + $0x184] ss:$16 sps:$4 sm:$0xff]  }
 0x213   :  { %791 = vmatmul.mubr.bf16.gmra.mrb[12].mxu1 %v5098_v45  ;;  %897 = vmatmul.mubr.bf16.gmra.mrb[4].mxu0 %v5098_v45 }
 0x214   :  { %806 = vmatpush1.bf16.msra.mxu1 %v3766_v57  ;;  %833 = vmatprep.mubr.bf16.mxu1 %v4932_v28  ;;  %v3786_v57 = vcombine.low %v357_v47, %v361_v48 }
 0x215   :  { %807 = vmatprep.subr.bf16.mxu1 %v3775_v58  ;;  %2570 = vmatprep.subr.bf16.mxu0 %v4320_v59  ;;  %v3795_v58 = vcombine.high %v365_v53, %v369_v54  ;;  %v373_v59 = vld [vmem:[#allocation2 + $0x198] sm:$0xff] }
 0x216   :  { %2571 = vmatpush1.bf16.msra.mxu0 %v4318_v62  ;;  %v4386_v62 = vld [vmem:[#allocation5 + $0x1a4] ss:$16 sps:$4 sm:$0xff]  }
 0x217   :  { %2572 = vmatprep.subr.bf16.mxu0 %v4326_v63  ;;  %v3794_v63 = vcombine.low %v365_v53, %v369_v54 }
 0x218   :  { %808 = vmatpush1.bf16.msra.mxu1 %v3774_v0  ;;  %v3803_v0 = vcombine.high %v373_v59, %v377_v60 }
 0x219   :  { %809 = vmatprep.subr.bf16.mxu1 %v3783_v1  ;;  %v381_v1 = vld [vmem:[#allocation2 + $0x1d8] sm:$0xff] }
 0x21a   :  { %2573 = vmatpush1.bf16.msra.mxu0 %v4324_v4  ;;  %v3802_v4 = vcombine.low %v373_v59, %v377_v60 }
 0x21b   :  { %2574 = vmatprep.subr.bf16.mxu0 %v4332_v5  ;;  %v3811_v5 = vcombine.high %v381_v1, %v385_v2 }
 0x21c   :  { %810 = vmatpush1.bf16.msra.mxu1 %v3782_v6  ;;  %v3810_v6 = vcombine.low %v381_v1, %v385_v2 }
 0x21d   :  { %811 = vmatprep.subr.bf16.mxu1 %v3791_v7  ;;  %v4311_v7 = vld [vmem:[#allocation5 + $0xc] ss:$16 sps:$4 sm:$0xff]  }
 0x21e   :  { %2575 = vmatpush1.bf16.msra.mxu0 %v4330_v10  ;;  %v4315_v10 = vld [vmem:[#allocation5 + $0x28] ss:$16 sps:$4 sm:$0xff]  }
 0x21f   :  { %2576 = vmatprep.subr.bf16.mxu0 %v4338_v11  ;;  %v4323_v11 = vld [vmem:[#allocation5 + $0x4c] ss:$16 sps:$4 sm:$0xff]  }
 0x220   :  { %812 = vmatpush1.bf16.msra.mxu1 %v3790_v12  ;;  %v4321_v12 = vld [vmem:[#allocation5 + $0x48] ss:$16 sps:$4 sm:$0xff]  }
 0x221   :  { %813 = vmatprep.subr.bf16.mxu1 %v3799_v13  ;;  %v4329_v13 = vld [vmem:[#allocation5 + $0x6c] ss:$16 sps:$4 sm:$0xff]  }
 0x222   :  { %2577 = vmatpush1.bf16.msra.mxu0 %v4336_v16  ;;  %v4333_v16 = vld [vmem:[#allocation5 + $0x88] ss:$16 sps:$4 sm:$0xff]  }
 0x223   :  { %2578 = vmatprep.subr.bf16.mxu0 %v4344_v17  ;;  %v4347_v17 = vld [vmem:[#allocation5 + $0xcc] ss:$16 sps:$4 sm:$0xff]  }
 0x224   :  { %814 = vmatpush1.bf16.msra.mxu1 %v3798_v18  ;;  %v4392_v18 = vld [vmem:[#allocation5 + $0x1c4] ss:$16 sps:$4 sm:$0xff]  }
 0x225   :  { %815 = vmatprep.subr.bf16.mxu1 %v3807_v19  ;;  %v4345_v19 = vld [vmem:[#allocation5 + $0xc8] ss:$16 sps:$4 sm:$0xff]  }
 0x226   :  { %2579 = vmatpush1.bf16.msra.mxu0 %v4342_v22  ;;  %v4351_v22 = vld [vmem:[#allocation5 + $0xe8] ss:$16 sps:$4 sm:$0xff]  }
 0x227   :  { %2580 = vmatprep.subr.bf16.mxu0 %v4350_v23  ;;  %v4396_v23 = vld [vmem:[#allocation5 + $0x1e0] ss:$16 sps:$4 sm:$0xff]  }
 0x228   :  { %816 = vmatpush1.bf16.msra.mxu1 %v3806_v24  ;;  %v4359_v24 = vld [vmem:[#allocation5 + $0x10c] ss:$16 sps:$4 sm:$0xff]  }
 0x229   :  { %907 = vmatprep.subr.bf16.mxu1 %v3755_v25  ;;  %v4404_v25 = vld [vmem:[#allocation5 + $0x204] ss:$16 sps:$4 sm:$0xff]  }
 0x22a   :  { %2581 = vmatpush1.bf16.msra.mxu0 %v4348_v29  ;;  %v4363_v29 = vld [vmem:[#allocation5 + $0x128] ss:$16 sps:$4 sm:$0xff]  }
 0x22b   :  { %834 = vmatmul.mubr.bf16.vlgmr.msra.gmra.mrb[16].mxu1 %v5100_v46  ;;  %2582 = vmatprep.subr.bf16.mxu0 %v4356_v30  ;;  %v4371_v30 = vld [vmem:[#allocation5 + $0x14c] ss:$16 sps:$4 sm:$0xff]  }
 0x22c   :  { %908 = vmatpush1.bf16.msra.mxu1 %v3754_v31  ;;  %843 = vmatprep.mubr.bf16.mxu1 %v4932_v28  ;;  %v4369_v31 = vld [vmem:[#allocation5 + $0x148] ss:$16 sps:$4 sm:$0xff]  }
 0x22d   :  { %909 = vmatprep.subr.bf16.mxu1 %v3763_v32  ;;  %v4377_v32 = vld [vmem:[#allocation5 + $0x16c] ss:$16 sps:$4 sm:$0xff]  }
 0x22e   :  { %2583 = vmatpush1.bf16.msra.mxu0 %v4354_v35  ;;  %v4381_v35 = vld [vmem:[#allocation5 + $0x188] ss:$16 sps:$4 sm:$0xff]  }
 0x22f   :  { %2584 = vmatprep.subr.bf16.mxu0 %v4362_v36  ;;  %v4389_v36 = vld [vmem:[#allocation5 + $0x1ac] ss:$16 sps:$4 sm:$0xff]  }
 0x230   :  { %910 = vmatpush1.bf16.msra.mxu1 %v3762_v37  ;;  %v4387_v37 = vld [vmem:[#allocation5 + $0x1a8] ss:$16 sps:$4 sm:$0xff]  }
 0x231   :  { %911 = vmatprep.subr.bf16.mxu1 %v3771_v38  ;;  %v4395_v38 = vld [vmem:[#allocation5 + $0x1cc] ss:$16 sps:$4 sm:$0xff]  }
 0x232   :  { %2585 = vmatpush1.bf16.msra.mxu0 %v4360_v41  ;;  %v4399_v41 = vld [vmem:[#allocation5 + $0x1e8] ss:$16 sps:$4 sm:$0xff]  }
 0x233   :  { %844 = vmatmul.mubr.bf16.gmra.mrb[20].mxu1 %v5098_v45  ;;  %2586 = vmatprep.subr.bf16.mxu0 %v4368_v42  ;;  %v4407_v42 = vld [vmem:[#allocation5 + $0x20c] ss:$16 sps:$4 sm:$0xff]  }
 0x234   :  { %912 = vmatpush1.bf16.msra.mxu1 %v3770_v43  ;;  %939 = vmatprep.mubr.bf16.mxu1 %v4932_v28  ;;  %v388_v43 = vlaneseq }
 0x235   :  { %913 = vmatprep.subr.bf16.mxu1 %v3779_v44 }
 0x236   :  { %2587 = vmatpush1.bf16.msra.mxu0 %v4366_v49  ;;  %v5116_v44 = vshrl.u32 %v388_v43, 7  ;;  %v5125_v49 = vld [vmem:[%s5240_s9] sm:$0xff] }
 0x237   :  { %2588 = vmatprep.subr.bf16.mxu0 %v4374_v50 }
 0x238   :  { %914 = vmatpush1.bf16.msra.mxu1 %v3778_v51  ;;  %v5119_v47 = vsub.s32 0, %v5116_v44  ;;  %v406_v48 = vsub.s32 4, %v5116_v44  ;;  %v5128_v50 = vsub.s32 1, %v5116_v44  ;;  %v410_v51 = vsub.s32 5, %v5116_v44 }
 0x239   :  { %915 = vmatprep.subr.bf16.mxu1 %v3787_v52 }
 0x23a   :  { %2589 = vmatpush1.bf16.msra.mxu0 %v4372_v55  ;;  %v391_v52 = vrot.slane %v5125_v49, %v5119_v47  ;;  %v407_v53 = vrot.slane %v5125_v49, %v406_v48  ;;  %v395_v54 = vrot.slane %v5125_v49, %v5128_v50  ;;  %v411_v55 = vrot.slane %v5125_v49, %v410_v51  ;;  %v4419_v51 = vld [vmem:[#allocation5 + $0x24c] ss:$16 sps:$4 sm:$0xff]  }
 0x23b   :  { %2590 = vmatprep.subr.bf16.mxu0 %v4380_v56 }
 0x23c   :  { %916 = vmatpush1.bf16.msra.mxu1 %v3786_v57 }
 0x23d   :  { %917 = vmatprep.subr.bf16.mxu1 %v3795_v58 }
 0x23e   :  { %2591 = vmatpush1.bf16.msra.mxu0 %v4378_v61 }
 0x23f   :  { %2592 = vmatprep.subr.bf16.mxu0 %v4386_v62 }
 0x240   :  { %918 = vmatpush1.bf16.msra.mxu1 %v3794_v63 }
 0x241   :  { %919 = vmatprep.subr.bf16.mxu1 %v3803_v0 }
 0x242   :  { %2593 = vmatpush1.bf16.msra.mxu0 %v4384_v3 }
 0x243   :  { %2594 = vmatprep.subr.bf16.mxu0 %v4392_v18 }
 0x244   :  { %920 = vmatpush1.bf16.msra.mxu1 %v3802_v4 }
 0x245   :  { %921 = vmatprep.subr.bf16.mxu1 %v3811_v5 }
 0x246   :  { %2595 = vmatpush1.bf16.msra.mxu0 %v4390_v20  ;;  %v4402_v20 = vld [vmem:[#allocation5 + $0x200] ss:$16 sps:$4 sm:$0xff]  }
 0x248   :  { %922 = vmatpush1.bf16.msra.mxu1 %v3810_v6 }
 0x249   :  { %2778 = vmatprep.subr.bf16.mxu1 %v4311_v7 }
 0x24b   :  { %940 = vmatmul.mubr.bf16.vlgmr.msra.gmra.mrb[24].mxu1 %v5100_v46  ;;  %v4341_v46 = vld [vmem:[#allocation5 + $0xac] ss:$16 sps:$4 sm:$0xff]  }
 0x24c   :  { %949 = vmatprep.mubr.bf16.mxu1 %v4932_v28  ;;  %2779 = vmatpush1.bf16.msra.mxu1 %v4309_v8  ;;  %v4339_v28 = vld [vmem:[#allocation5 + $0xa8] ss:$16 sps:$4 sm:$0xff]  }
 0x24d   :  { %2780 = vmatprep.subr.bf16.mxu1 %v4317_v9 }
 0x250   :  { %2781 = vmatpush1.bf16.msra.mxu1 %v4315_v10 }
 0x251   :  { %2782 = vmatprep.subr.bf16.mxu1 %v4323_v11 }
 0x253   :  { %950 = vmatmul.mubr.bf16.gmra.mrb[28].mxu1 %v5098_v45  ;;  %v4398_v45 = vld [vmem:[#allocation5 + $0x1e4] ss:$16 sps:$4 sm:$0xff]  }
 0x254   :  { %2783 = vmatpush1.bf16.msra.mxu1 %v4321_v12  ;;  %2596 = vmatprep.subr.bf16.mxu0 %v4398_v45 }
 0x255   :  { %2784 = vmatprep.subr.bf16.mxu1 %v4329_v13  ;;  %2597 = vmatpush1.bf16.msra.mxu0 %v4396_v23 }
 0x256   :  { %2619 = vmatprep.subr.bf16.mxu0 %v4404_v25  ;;  %v4410_v25 = vld [vmem:[#allocation5 + $0x224] ss:$16 sps:$4 sm:$0xff]  }
 0x258   :  { %2785 = vmatpush1.bf16.msra.mxu1 %v4327_v14 }
 0x259   :  { %2786 = vmatprep.subr.bf16.mxu1 %v4335_v15 }
 0x25c   :  { %2787 = vmatpush1.bf16.msra.mxu1 %v4333_v16 }
 0x25d   :  { %2788 = vmatprep.subr.bf16.mxu1 %v4341_v46 }
 0x260   :  { %2789 = vmatpush1.bf16.msra.mxu1 %v4339_v28 }
 0x261   :  { %2790 = vmatprep.subr.bf16.mxu1 %v4347_v17 }
 0x264   :  { %2791 = vmatpush1.bf16.msra.mxu1 %v4345_v19 }
 0x265   :  { %2792 = vmatprep.subr.bf16.mxu1 %v4353_v21  ;;  %v4405_v21 = vld [vmem:[#allocation5 + $0x208] ss:$16 sps:$4 sm:$0xff]  }
 0x268   :  { %2793 = vmatpush1.bf16.msra.mxu1 %v4351_v22 }
 0x269   :  { %2794 = vmatprep.subr.bf16.mxu1 %v4359_v24 }
 0x26c   :  { %2795 = vmatpush1.bf16.msra.mxu1 %v4357_v26  ;;  %v4413_v26 = vld [vmem:[#allocation5 + $0x22c] ss:$16 sps:$4 sm:$0xff]  }
 0x26d   :  { %2796 = vmatprep.subr.bf16.mxu1 %v4365_v27 }
 0x270   :  { %2797 = vmatpush1.bf16.msra.mxu1 %v4363_v29 }
 0x271   :  { %2798 = vmatprep.subr.bf16.mxu1 %v4371_v30 }
 0x274   :  { %2799 = vmatpush1.bf16.msra.mxu1 %v4369_v31 }
 0x275   :  { %2800 = vmatprep.subr.bf16.mxu1 %v4377_v32 }
 0x278   :  { %2801 = vmatpush1.bf16.msra.mxu1 %v4375_v33 }
 0x279   :  { %2802 = vmatprep.subr.bf16.mxu1 %v4383_v34 }
 0x27c   :  { %2803 = vmatpush1.bf16.msra.mxu1 %v4381_v35 }
 0x27d   :  { %2804 = vmatprep.subr.bf16.mxu1 %v4389_v36 }
 0x280   :  { %2805 = vmatpush1.bf16.msra.mxu1 %v4387_v37 }
 0x281   :  { %2806 = vmatprep.subr.bf16.mxu1 %v4395_v38  ;;  %v4408_v38 = vld [vmem:[#allocation5 + $0x220] ss:$16 sps:$4 sm:$0xff]  }
 0x284   :  { %2807 = vmatpush1.bf16.msra.mxu1 %v4393_v39  ;;  %v4411_v39 = vld [vmem:[#allocation5 + $0x228] ss:$16 sps:$4 sm:$0xff]  }
 0x285   :  { %2808 = vmatprep.subr.bf16.mxu1 %v4401_v40  ;;  %v4416_v40 = vld [vmem:[#allocation5 + $0x244] ss:$16 sps:$4 sm:$0xff]  }
 0x288   :  { %2809 = vmatpush1.bf16.msra.mxu1 %v4399_v41 }
 0x289   :  { %2831 = vmatprep.subr.bf16.mxu1 %v4407_v42 }
 0x2de   :  { %v782_v56 = vpop.f32.mrb[8].mxu1  ;;  %v888_v57 = vpop.f32.mrb[0].mxu0 }
 0x2df   :  { %v783_v58 = vadd.f32 %v782_v56, %v391_v52  ;;  %v889_v59 = vadd.f32 %v888_v57, %v407_v53  ;;  %v784_v60 = vpop.f32.mrb[9].mxu1  ;;  %v890_v61 = vpop.f32.mrb[1].mxu0 }
 0x2e0   :  { %v785_v62 = vadd.f32 %v784_v60, %v395_v54  ;;  %v891_v63 = vadd.f32 %v890_v61, %v411_v55  ;;  %v786_v0 = vpop.f32.mrb[10].mxu1  ;;  %v892_v1 = vpop.f32.mrb[2].mxu0  ;;  %v4414_v60 = vld [vmem:[#allocation5 + $0x240] ss:$16 sps:$4 sm:$0xff]   ;;  %v4417_v61 = vld [vmem:[#allocation5 + $0x248] ss:$16 sps:$4 sm:$0xff]  }
 0x2e1   :  { %v787_v2 = vadd.f32 %v786_v0, %v391_v52  ;;  %v893_v3 = vadd.f32 %v892_v1, %v407_v53  ;;  %v788_v4 = vpop.f32.mrb[11].mxu1  ;;  %v894_v5 = vpop.f32.mrb[3].mxu0  ;;  %v960_v8 = vmax.f32 %v783_v58, 0.0  ;;  %v964_v9 = vmax.f32 %v889_v59, 0.0  ;;  %v4420_v0 = vld [vmem:[#allocation5 + $0x260] ss:$16 sps:$4 sm:$0xff]  }
 0x2e2   :  { %v789_v6 = vadd.f32 %v788_v4, %v395_v54  ;;  %v895_v7 = vadd.f32 %v894_v5, %v411_v55  ;;  %v961_v12 = vmax.f32 %v785_v62, 0.0  ;;  %v965_v13 = vmax.f32 %v891_v63, 0.0  ;;  %v4422_v62 = vld [vmem:[#allocation5 + $0x264] ss:$16 sps:$4 sm:$0xff]   ;;  %v4425_v63 = vld [vmem:[#allocation5 + $0x26c] ss:$16 sps:$4 sm:$0xff]  }
 0x2e3   :  { %v968_v10 = vmax.f32 %v787_v2, 0.0  ;;  %v972_v11 = vmax.f32 %v893_v3, 0.0  ;;  %v4423_v1 = vld [vmem:[#allocation5 + $0x268] ss:$16 sps:$4 sm:$0xff]   ;;  %v4428_v2 = vld [vmem:[#allocation5 + $0x284] ss:$16 sps:$4 sm:$0xff]  }
 0x2e4   :  { %v969_v14 = vmax.f32 %v789_v6, 0.0  ;;  %v973_v15 = vmax.f32 %v895_v7, 0.0  ;;  %v4431_v3 = vld [vmem:[#allocation5 + $0x28c] ss:$16 sps:$4 sm:$0xff]   ;;  %v4426_v4 = vld [vmem:[#allocation5 + $0x280] ss:$16 sps:$4 sm:$0xff]  }
 0x2e5   :  { %v992_v16 = vpack.c.bf16 %v968_v10, %v960_v8  ;;  %v5137_v46 = vpack.c.bf16 %v972_v11, %v964_v9  ;;  %v4429_v5 = vld [vmem:[#allocation5 + $0x288] ss:$16 sps:$4 sm:$0xff]   ;;  %v4434_v6 = vld [vmem:[#allocation5 + $0x2a4] ss:$16 sps:$4 sm:$0xff]   ;;  %v4437_v7 = vld [vmem:[#allocation5 + $0x2ac] ss:$16 sps:$4 sm:$0xff]  }
 0x2e6   :  { %v993_v28 = vpack.c.bf16 %v969_v14, %v961_v12  ;;  %v5139_v17 = vpack.c.bf16 %v973_v15, %v965_v13  ;;  %v792_v18 = vpop.f32.mrb[12].mxu1  ;;  %v898_v19 = vpop.f32.mrb[4].mxu0  ;;  %v398_v8 = vsub.s32 2, %v5116_v44  ;;  %v402_v9 = vsub.s32 3, %v5116_v44  ;;  %v4432_v10 = vld [vmem:[#allocation5 + $0x2a0] ss:$16 sps:$4 sm:$0xff]  }
 0x2e7   :  { %v793_v45 = vadd.f32 %v792_v18, %v391_v52  ;;  %v899_v22 = vadd.f32 %v898_v19, %v407_v53  ;;  %v794_v23 = vpop.f32.mrb[13].mxu1  ;;  %v900_v24 = vpop.f32.mrb[5].mxu0  ;;  %v4435_v11 = vld [vmem:[#allocation5 + $0x2a8] ss:$16 sps:$4 sm:$0xff]   ;;  %v4440_v13 = vld [vmem:[#allocation5 + $0x2c4] ss:$16 sps:$4 sm:$0xff]  }
 0x2e8   :  { %v795_v27 = vadd.f32 %v794_v23, %v395_v54  ;;  %v901_v29 = vadd.f32 %v900_v24, %v411_v55  ;;  %v796_v30 = vpop.f32.mrb[14].mxu1  ;;  %v902_v31 = vpop.f32.mrb[6].mxu0  ;;  %2598 = vmatprep.mubr.bf16.mxu0 %v993_v28  ;;  %2810 = vmatprep.mubr.bf16.mxu1 %v993_v28  ;;  %v399_v12 = vrot.slane %v5125_v49, %v398_v8  ;;  %v4443_v14 = vld [vmem:[#allocation5 + $0x2cc] ss:$16 sps:$4 sm:$0xff]   ;;  %v4438_v28 = vld [vmem:[#allocation5 + $0x2c0] ss:$16 sps:$4 sm:$0xff]  }
 0x2e9   :  { %v797_v32 = vadd.f32 %v796_v30, %v391_v52  ;;  %v903_v33 = vadd.f32 %v902_v31, %v407_v53  ;;  %v798_v34 = vpop.f32.mrb[15].mxu1  ;;  %v904_v35 = vpop.f32.mrb[7].mxu0  ;;  %2599 = vmatmul.mubr.bf16.vlgmr.msra.gmra.mrb[8].mxu0 %v992_v16  ;;  %2811 = vmatmul.mubr.bf16.vlgmr.msra.gmra.mrb[32].mxu1 %v992_v16  ;;  %v976_v41 = vmax.f32 %v793_v45, 0.0  ;;  %v980_v42 = vmax.f32 %v899_v22, 0.0  ;;  %v4441_v18 = vld [vmem:[#allocation5 + $0x2c8] ss:$16 sps:$4 sm:$0xff]  }
 0x2ea   :  { %v799_v36 = vadd.f32 %v798_v34, %v395_v54  ;;  %v905_v37 = vadd.f32 %v904_v35, %v411_v55  ;;  %2620 = vmatpush1.bf16.msra.mxu0 %v4402_v20  ;;  %2832 = vmatpush1.bf16.msra.mxu1 %v4405_v21  ;;  %v977_v52 = vmax.f32 %v795_v27, 0.0  ;;  %v981_v53 = vmax.f32 %v901_v29, 0.0  ;;  %v4446_v21 = vld [vmem:[#allocation5 + $0x2e4] ss:$16 sps:$4 sm:$0xff]   ;;  %v4449_v45 = vld [vmem:[#allocation5 + $0x2ec] ss:$16 sps:$4 sm:$0xff]  }
 0x2eb   :  { %v984_v43 = vmax.f32 %v797_v32, 0.0  ;;  %v988_v48 = vmax.f32 %v903_v33, 0.0  ;;  %2621 = vmatprep.subr.bf16.mxu0 %v4410_v25  ;;  %2833 = vmatprep.subr.bf16.mxu1 %v4413_v26  ;;  %v403_v15 = vrot.slane %v5125_v49, %v402_v9  ;;  %v4444_v27 = vld [vmem:[#allocation5 + $0x2e0] ss:$16 sps:$4 sm:$0xff]   ;;  %v4447_v29 = vld [vmem:[#allocation5 + $0x2e8] ss:$16 sps:$4 sm:$0xff]  }
 0x2ec   :  { %v985_v56 = vmax.f32 %v799_v36, 0.0  ;;  %v989_v57 = vmax.f32 %v905_v37, 0.0  ;;  %v4452_v32 = vld [vmem:[#allocation5 + $0x304] ss:$16 sps:$4 sm:$0xff]   ;;  %v4455_v33 = vld [vmem:[#allocation5 + $0x30c] ss:$16 sps:$4 sm:$0xff]  }
 0x2ed   :  { %v1000_v58 = vpack.c.bf16 %v984_v43, %v976_v41  ;;  %v5141_v59 = vpack.c.bf16 %v988_v48, %v980_v42  ;;  %v4458_v43 = vld [vmem:[#allocation5 + $0x324] ss:$16 sps:$4 sm:$0xff]   ;;  %v4461_v48 = vld [vmem:[#allocation5 + $0x32c] ss:$16 sps:$4 sm:$0xff]  }
 0x2ee   :  { %v1001_v54 = vpack.c.bf16 %v985_v56, %v977_v52  ;;  %v5143_v55 = vpack.c.bf16 %v989_v57, %v981_v53  ;;  %2622 = vmatpush1.bf16.msra.mxu0 %v4408_v38  ;;  %2834 = vmatpush1.bf16.msra.mxu1 %v4411_v39  ;;  %v4450_v39 = vld [vmem:[#allocation5 + $0x300] ss:$16 sps:$4 sm:$0xff]  }
 0x2ef   :  { %2623 = vmatprep.subr.bf16.mxu0 %v4416_v40  ;;  %2835 = vmatprep.subr.bf16.mxu1 %v4419_v51  ;;  %v4453_v40 = vld [vmem:[#allocation5 + $0x308] ss:$16 sps:$4 sm:$0xff]  }
 0x2f0   :  { %2608 = vmatprep.mubr.bf16.mxu0 %v1001_v54  ;;  %2820 = vmatprep.mubr.bf16.mxu1 %v1001_v54  ;;  %v4459_v54 = vld [vmem:[#allocation5 + $0x328] ss:$16 sps:$4 sm:$0xff]  }
 0x2f1   :  { %2609 = vmatmul.mubr.bf16.gmra.mrb[12].mxu0 %v1000_v58  ;;  %2821 = vmatmul.mubr.bf16.gmra.mrb[36].mxu1 %v1000_v58  ;;  %v4456_v58 = vld [vmem:[#allocation5 + $0x320] ss:$16 sps:$4 sm:$0xff]  }
 0x2f2   :  { %2624 = vmatpush1.bf16.msra.mxu0 %v4414_v60  ;;  %2836 = vmatpush1.bf16.msra.mxu1 %v4417_v61 }
 0x2f3   :  { %2625 = vmatprep.subr.bf16.mxu0 %v4422_v62  ;;  %2837 = vmatprep.subr.bf16.mxu1 %v4425_v63  ;;  %v4464_v62 = vld [vmem:[#allocation5 + $0x344] ss:$16 sps:$4 sm:$0xff]   ;;  %v4467_v63 = vld [vmem:[#allocation5 + $0x34c] ss:$16 sps:$4 sm:$0xff]  }
 0x2f6   :  { %2626 = vmatpush1.bf16.msra.mxu0 %v4420_v0  ;;  %2838 = vmatpush1.bf16.msra.mxu1 %v4423_v1 }
 0x2f7   :  { %2627 = vmatprep.subr.bf16.mxu0 %v4428_v2  ;;  %2839 = vmatprep.subr.bf16.mxu1 %v4431_v3 }
 0x2fa   :  { %2628 = vmatpush1.bf16.msra.mxu0 %v4426_v4  ;;  %2840 = vmatpush1.bf16.msra.mxu1 %v4429_v5  ;;  %v4462_v4 = vld [vmem:[#allocation5 + $0x340] ss:$16 sps:$4 sm:$0xff]   ;;  %v4465_v5 = vld [vmem:[#allocation5 + $0x348] ss:$16 sps:$4 sm:$0xff]  }
 0x2fb   :  { %2629 = vmatprep.subr.bf16.mxu0 %v4434_v6  ;;  %2841 = vmatprep.subr.bf16.mxu1 %v4437_v7  ;;  %v4470_v6 = vld [vmem:[#allocation5 + $0x364] ss:$16 sps:$4 sm:$0xff]   ;;  %v4473_v7 = vld [vmem:[#allocation5 + $0x36c] ss:$16 sps:$4 sm:$0xff]  }
 0x2fe   :  { %v835_v16 = vpop.f32.mrb[16].mxu1  ;;  %2630 = vmatpush1.bf16.msra.mxu0 %v4432_v10  ;;  %2842 = vmatpush1.bf16.msra.mxu1 %v4435_v11  ;;  %v4468_v10 = vld [vmem:[#allocation5 + $0x360] ss:$16 sps:$4 sm:$0xff]   ;;  %v4471_v11 = vld [vmem:[#allocation5 + $0x368] ss:$16 sps:$4 sm:$0xff]  }
 0x2ff   :  { %v836_v19 = vadd.f32 %v835_v16, %v399_v12  ;;  %v837_v20 = vpop.f32.mrb[17].mxu1  ;;  %2631 = vmatprep.subr.bf16.mxu0 %v4440_v13  ;;  %2843 = vmatprep.subr.bf16.mxu1 %v4443_v14  ;;  %v4479_v13 = vld [vmem:[#allocation5 + $0x38c] ss:$16 sps:$4 sm:$0xff]   ;;  %v4474_v14 = vld [vmem:[#allocation5 + $0x380] ss:$16 sps:$4 sm:$0xff]  }
 0x300   :  { %v838_v22 = vadd.f32 %v837_v20, %v403_v15  ;;  %v839_v23 = vpop.f32.mrb[18].mxu1  ;;  %v4482_v16 = vld [vmem:[#allocation5 + $0x3a4] ss:$16 sps:$4 sm:$0xff]   ;;  %v4480_v20 = vld [vmem:[#allocation5 + $0x3a0] ss:$16 sps:$4 sm:$0xff]  }
 0x301   :  { %v840_v24 = vadd.f32 %v839_v23, %v399_v12  ;;  %v841_v25 = vpop.f32.mrb[19].mxu1  ;;  %v962_v30 = vmax.f32 %v836_v19, 0.0  ;;  %v418_v19 = vsub.s32 7, %v5116_v44  ;;  %v4491_v23 = vld [vmem:[#allocation5 + $0x3cc] ss:$16 sps:$4 sm:$0xff]  }
 0x302   :  { %v842_v26 = vadd.f32 %v841_v25, %v403_v15  ;;  %2632 = vmatpush1.bf16.msra.mxu0 %v4438_v28  ;;  %2844 = vmatpush1.bf16.msra.mxu1 %v4441_v18  ;;  %v963_v34 = vmax.f32 %v838_v22, 0.0  ;;  %v4485_v28 = vld [vmem:[#allocation5 + $0x3ac] ss:$16 sps:$4 sm:$0xff]   ;;  %v414_v18 = vsub.s32 6, %v5116_v44  ;;  %v4488_v22 = vld [vmem:[#allocation5 + $0x3c4] ss:$16 sps:$4 sm:$0xff]  }
 0x303   :  { %v970_v31 = vmax.f32 %v840_v24, 0.0  ;;  %2633 = vmatprep.subr.bf16.mxu0 %v4446_v21  ;;  %2845 = vmatprep.subr.bf16.mxu1 %v4449_v45  ;;  %v4483_v21 = vld [vmem:[#allocation5 + $0x3a8] ss:$16 sps:$4 sm:$0xff]   ;;  %v419_v24 = vrot.slane %v5125_v49, %v418_v19  ;;  %v4518_v19 = vld [vmem:[#allocation5 + $0x464] ss:$16 sps:$4 sm:$0xff]  }
 0x304   :  { %v971_v35 = vmax.f32 %v842_v26, 0.0  ;;  %v415_v45 = vrot.slane %v5125_v49, %v414_v18  ;;  %v4486_v26 = vld [vmem:[#allocation5 + $0x3c0] ss:$16 sps:$4 sm:$0xff]   ;;  %v4495_v49 = vld [vmem:[#allocation5 + $0x3e8] ss:$16 sps:$4 sm:$0xff]  }
 0x305   :  { %v5153_v36 = vpack.c.bf16 %v970_v31, %v962_v30  ;;  %v4494_v31 = vld [vmem:[#allocation5 + $0x3e4] ss:$16 sps:$4 sm:$0xff]   ;;  %v4513_v18 = vld [vmem:[#allocation5 + $0x448] ss:$16 sps:$4 sm:$0xff]  }
 0x306   :  { %v995_v37 = vpack.c.bf16 %v971_v35, %v963_v34  ;;  %v845_v38 = vpop.f32.mrb[20].mxu1  ;;  %2634 = vmatpush1.bf16.msra.mxu0 %v4444_v27  ;;  %2846 = vmatpush1.bf16.msra.mxu1 %v4447_v29  ;;  %v4489_v27 = vld [vmem:[#allocation5 + $0x3c8] ss:$16 sps:$4 sm:$0xff]  }
 0x307   :  { %v846_v41 = vadd.f32 %v845_v38, %v399_v12  ;;  %v847_v42 = vpop.f32.mrb[21].mxu1  ;;  %2635 = vmatprep.subr.bf16.mxu0 %v4452_v32  ;;  %2847 = vmatprep.subr.bf16.mxu1 %v4455_v33  ;;  %v4497_v32 = vld [vmem:[#allocation5 + $0x3ec] ss:$16 sps:$4 sm:$0xff]  }
 0x308   :  { %v848_v51 = vadd.f32 %v847_v42, %v403_v15  ;;  %v849_v52 = vpop.f32.mrb[22].mxu1  ;;  %2651 = vmatprep.mubr.bf16.mxu0 %v995_v37  ;;  %2863 = vmatprep.mubr.bf16.mxu1 %v995_v37  ;;  %v4500_v42 = vld [vmem:[#allocation5 + $0x404] ss:$16 sps:$4 sm:$0xff]  }
 0x309   :  { %v850_v53 = vadd.f32 %v849_v52, %v399_v12  ;;  %v851_v56 = vpop.f32.mrb[23].mxu1  ;;  %v978_v60 = vmax.f32 %v846_v41, 0.0  ;;  %v4476_v12 = vld [vmem:[#allocation5 + $0x384] ss:$16 sps:$4 sm:$0xff]  }
 0x30a   :  { %v852_v57 = vadd.f32 %v851_v56, %v403_v15  ;;  %2636 = vmatpush1.bf16.msra.mxu0 %v4450_v39  ;;  %2848 = vmatpush1.bf16.msra.mxu1 %v4453_v40  ;;  %v979_v0 = vmax.f32 %v848_v51, 0.0  ;;  %v4477_v15 = vld [vmem:[#allocation5 + $0x388] ss:$16 sps:$4 sm:$0xff]   ;;  %v4492_v39 = vld [vmem:[#allocation5 + $0x3e0] ss:$16 sps:$4 sm:$0xff]  }
 0x30b   :  { %v986_v61 = vmax.f32 %v850_v53, 0.0  ;;  %2637 = vmatprep.subr.bf16.mxu0 %v4458_v43  ;;  %2849 = vmatprep.subr.bf16.mxu1 %v4461_v48  ;;  %v4503_v43 = vld [vmem:[#allocation5 + $0x40c] ss:$16 sps:$4 sm:$0xff]  }
 0x30c   :  { %v987_v1 = vmax.f32 %v852_v57, 0.0  ;;  %v4498_v57 = vld [vmem:[#allocation5 + $0x400] ss:$16 sps:$4 sm:$0xff]  }
 0x30d   :  { %v5155_v2 = vpack.c.bf16 %v986_v61, %v978_v60  ;;  %v4501_v60 = vld [vmem:[#allocation5 + $0x408] ss:$16 sps:$4 sm:$0xff]  }
 0x30e   :  { %v5157_v3 = vpack.c.bf16 %v987_v1, %v979_v0  ;;  %2638 = vmatpush1.bf16.msra.mxu0 %v4456_v58  ;;  %2850 = vmatpush1.bf16.msra.mxu1 %v4459_v54  ;;  %v4509_v0 = vld [vmem:[#allocation5 + $0x42c] ss:$16 sps:$4 sm:$0xff]  }
 0x30f   :  { %2639 = vmatprep.subr.bf16.mxu0 %v4464_v62  ;;  %2851 = vmatprep.subr.bf16.mxu1 %v4467_v63  ;;  %v4506_v63 = vld [vmem:[#allocation5 + $0x424] ss:$16 sps:$4 sm:$0xff]  }
 0x312   :  { %2640 = vmatpush1.bf16.msra.mxu0 %v4462_v4  ;;  %2852 = vmatpush1.bf16.msra.mxu1 %v4465_v5 }
 0x313   :  { %2641 = vmatprep.subr.bf16.mxu0 %v4470_v6  ;;  %2853 = vmatprep.subr.bf16.mxu1 %v4473_v7  ;;  %v4504_v6 = vld [vmem:[#allocation5 + $0x420] ss:$16 sps:$4 sm:$0xff]  }
 0x316   :  { %2642 = vmatpush1.bf16.msra.mxu0 %v4468_v10  ;;  %2854 = vmatpush1.bf16.msra.mxu1 %v4471_v11  ;;  %v4507_v11 = vld [vmem:[#allocation5 + $0x428] ss:$16 sps:$4 sm:$0xff]  }
 0x317   :  { %2643 = vmatprep.subr.bf16.mxu0 %v4476_v12  ;;  %2855 = vmatprep.subr.bf16.mxu1 %v4479_v13  ;;  %v4512_v12 = vld [vmem:[#allocation5 + $0x444] ss:$16 sps:$4 sm:$0xff]  }
 0x31a   :  { %2644 = vmatpush1.bf16.msra.mxu0 %v4474_v14  ;;  %2856 = vmatpush1.bf16.msra.mxu1 %v4477_v15  ;;  %v4515_v15 = vld [vmem:[#allocation5 + $0x44c] ss:$16 sps:$4 sm:$0xff]  }
 0x31b   :  { %2645 = vmatprep.subr.bf16.mxu0 %v4482_v16  ;;  %2857 = vmatprep.subr.bf16.mxu1 %v4485_v28  ;;  %v4510_v28 = vld [vmem:[#allocation5 + $0x440] ss:$16 sps:$4 sm:$0xff]  }
 0x31e   :  { %v941_v25 = vpop.f32.mrb[24].mxu1  ;;  %2646 = vmatpush1.bf16.msra.mxu0 %v4480_v20  ;;  %2858 = vmatpush1.bf16.msra.mxu1 %v4483_v21  ;;  %v4516_v20 = vld [vmem:[#allocation5 + $0x460] ss:$16 sps:$4 sm:$0xff]   ;;  %v4519_v21 = vld [vmem:[#allocation5 + $0x468] ss:$16 sps:$4 sm:$0xff]  }
 0x31f   :  { %v942_v29 = vadd.f32 %v941_v25, %v415_v45  ;;  %v943_v30 = vpop.f32.mrb[25].mxu1  ;;  %2647 = vmatprep.subr.bf16.mxu0 %v4488_v22  ;;  %2859 = vmatprep.subr.bf16.mxu1 %v4491_v23  ;;  %v4527_v22 = vld [vmem:[#allocation5 + $0x48c] ss:$16 sps:$4 sm:$0xff]   ;;  %v4522_v23 = vld [vmem:[#allocation5 + $0x480] ss:$16 sps:$4 sm:$0xff]  }
 0x320   :  { %v944_v33 = vadd.f32 %v943_v30, %v419_v24  ;;  %v945_v34 = vpop.f32.mrb[26].mxu1  ;;  %v4530_v25 = vld [vmem:[#allocation5 + $0x4a4] ss:$16 sps:$4 sm:$0xff]   ;;  %v4534_v30 = vld [vmem:[#allocation5 + $0x4c0] ss:$16 sps:$4 sm:$0xff]  }
 0x321   :  { %v946_v35 = vadd.f32 %v945_v34, %v415_v45  ;;  %v947_v37 = vpop.f32.mrb[27].mxu1  ;;  %v966_v40 = vmax.f32 %v942_v29, 0.0  ;;  %v4536_v29 = vld [vmem:[#allocation5 + $0x4c4] ss:$16 sps:$4 sm:$0xff]   ;;  %v4540_v34 = vld [vmem:[#allocation5 + $0x4e0] ss:$16 sps:$4 sm:$0xff]  }
 0x322   :  { %v948_v38 = vadd.f32 %v947_v37, %v419_v24  ;;  %2648 = vmatpush1.bf16.msra.mxu0 %v4486_v26  ;;  %2860 = vmatpush1.bf16.msra.mxu1 %v4489_v27  ;;  %v967_v48 = vmax.f32 %v944_v33, 0.0  ;;  %v4528_v26 = vld [vmem:[#allocation5 + $0x4a0] ss:$16 sps:$4 sm:$0xff]   ;;  %v4531_v27 = vld [vmem:[#allocation5 + $0x4a8] ss:$16 sps:$4 sm:$0xff]  }
 0x323   :  { %v974_v41 = vmax.f32 %v946_v35, 0.0  ;;  %2649 = vmatprep.subr.bf16.mxu0 %v4494_v31  ;;  %2861 = vmatprep.subr.bf16.mxu1 %v4497_v32  ;;  %v4537_v31 = vld [vmem:[#allocation5 + $0x4c8] ss:$16 sps:$4 sm:$0xff]   ;;  %v4542_v32 = vld [vmem:[#allocation5 + $0x4e4] ss:$16 sps:$4 sm:$0xff]  }
 0x324   :  { %v975_v51 = vmax.f32 %v948_v38, 0.0  ;;  %v4545_v33 = vld [vmem:[#allocation5 + $0x4ec] ss:$16 sps:$4 sm:$0xff]   ;;  %v4543_v35 = vld [vmem:[#allocation5 + $0x4e8] ss:$16 sps:$4 sm:$0xff]  }
 0x325   :  { %v5163_v52 = vpack.c.bf16 %v974_v41, %v966_v40  ;;  %v4548_v37 = vld [vmem:[#allocation5 + $0x504] ss:$16 sps:$4 sm:$0xff]   ;;  %v4551_v38 = vld [vmem:[#allocation5 + $0x50c] ss:$16 sps:$4 sm:$0xff]  }
 0x326   :  { %v5165_v53 = vpack.c.bf16 %v975_v51, %v967_v48  ;;  %v951_v56 = vpop.f32.mrb[28].mxu1  ;;  %2650 = vmatpush1.bf16.msra.mxu0 %v4492_v39  ;;  %2862 = vmatpush1.bf16.msra.mxu1 %v4495_v49  ;;  %v4546_v39 = vld [vmem:[#allocation5 + $0x500] ss:$16 sps:$4 sm:$0xff]   ;;  %v4549_v49 = vld [vmem:[#allocation5 + $0x508] ss:$16 sps:$4 sm:$0xff]  }
 0x327   :  { %v952_v58 = vadd.f32 %v951_v56, %v415_v45  ;;  %v953_v54 = vpop.f32.mrb[29].mxu1  ;;  %2672 = vmatprep.subr.bf16.mxu0 %v4500_v42  ;;  %2884 = vmatprep.subr.bf16.mxu1 %v4503_v43  ;;  %v4554_v40 = vld [vmem:[#allocation5 + $0x524] ss:$16 sps:$4 sm:$0xff]   ;;  %v4557_v41 = vld [vmem:[#allocation5 + $0x52c] ss:$16 sps:$4 sm:$0xff]  }
 0x328   :  { %v954_v61 = vadd.f32 %v953_v54, %v419_v24  ;;  %v955_v62 = vpop.f32.mrb[30].mxu1  ;;  %v4552_v42 = vld [vmem:[#allocation5 + $0x520] ss:$16 sps:$4 sm:$0xff]   ;;  %v4555_v43 = vld [vmem:[#allocation5 + $0x528] ss:$16 sps:$4 sm:$0xff]  }
 0x329   :  { %v956_v1 = vadd.f32 %v955_v62, %v415_v45  ;;  %v957_v4 = vpop.f32.mrb[31].mxu1  ;;  %2652 = vmatmul.mubr.bf16.vlgmr.msra.gmra.mrb[8].mxu0 %v5153_v36  ;;  %2864 = vmatmul.mubr.bf16.vlgmr.msra.gmra.mrb[32].mxu1 %v5153_v36  ;;  %v982_v7 = vmax.f32 %v952_v58, 0.0  ;;  %v4524_v45 = vld [vmem:[#allocation5 + $0x484] ss:$16 sps:$4 sm:$0xff]   ;;  %v4563_v51 = vld [vmem:[#allocation5 + $0x54c] ss:$16 sps:$4 sm:$0xff]  }
 0x32a   :  { %v958_v5 = vadd.f32 %v957_v4, %v419_v24  ;;  %2661 = vmatprep.mubr.bf16.mxu0 %v5157_v3  ;;  %2673 = vmatpush1.bf16.msra.mxu0 %v4498_v57  ;;  %v983_v13 = vmax.f32 %v954_v61, 0.0  ;;  %v4525_v24 = vld [vmem:[#allocation5 + $0x488] ss:$16 sps:$4 sm:$0xff]   ;;  %v4560_v48 = vld [vmem:[#allocation5 + $0x544] ss:$16 sps:$4 sm:$0xff]  }
 0x32b   :  { %v990_v10 = vmax.f32 %v956_v1, 0.0  ;;  %2873 = vmatprep.mubr.bf16.mxu1 %v5157_v3  ;;  %2885 = vmatpush1.bf16.msra.mxu1 %v4501_v60  ;;  %v4521_v3 = vld [vmem:[#allocation5 + $0x46c] ss:$16 sps:$4 sm:$0xff]   ;;  %v4558_v56 = vld [vmem:[#allocation5 + $0x540] ss:$16 sps:$4 sm:$0xff]  }
 0x32c   :  { %v991_v14 = vmax.f32 %v958_v5, 0.0  ;;  %2674 = vmatprep.subr.bf16.mxu0 %v4506_v63  ;;  %2886 = vmatprep.subr.bf16.mxu1 %v4509_v0  ;;  %v4561_v57 = vld [vmem:[#allocation5 + $0x548] ss:$16 sps:$4 sm:$0xff]   ;;  %v4566_v58 = vld [vmem:[#allocation5 + $0x564] ss:$16 sps:$4 sm:$0xff]  }
 0x32d   :  { %v5171_v16 = vpack.c.bf16 %v990_v10, %v982_v7  ;;  %v4569_v54 = vld [vmem:[#allocation5 + $0x56c] ss:$16 sps:$4 sm:$0xff]   ;;  %v4564_v60 = vld [vmem:[#allocation5 + $0x560] ss:$16 sps:$4 sm:$0xff]   ;;  %v4567_v61 = vld [vmem:[#allocation5 + $0x568] ss:$16 sps:$4 sm:$0xff]  }
 0x32e   :  { %v5173_v36 = vpack.c.bf16 %v991_v14, %v983_v13  ;;  %2675 = vmatpush1.bf16.msra.mxu0 %v4504_v6  ;;  %v4572_v62 = vld [vmem:[#allocation5 + $0x584] ss:$16 sps:$4 sm:$0xff]   ;;  %v4575_v63 = vld [vmem:[#allocation5 + $0x58c] ss:$16 sps:$4 sm:$0xff]   ;;  %v4570_v0 = vld [vmem:[#allocation5 + $0x580] ss:$16 sps:$4 sm:$0xff]  }
 0x32f   :  { %2887 = vmatpush1.bf16.msra.mxu1 %v4507_v11  ;;  %2676 = vmatprep.subr.bf16.mxu0 %v4512_v12  ;;  %v4573_v1 = vld [vmem:[#allocation5 + $0x588] ss:$16 sps:$4 sm:$0xff]   ;;  %v4578_v4 = vld [vmem:[#allocation5 + $0x5a4] ss:$16 sps:$4 sm:$0xff]   ;;  %v4581_v5 = vld [vmem:[#allocation5 + $0x5ac] ss:$16 sps:$4 sm:$0xff]  }
 0x330   :  { %2888 = vmatprep.subr.bf16.mxu1 %v4515_v15  ;;  %v4576_v6 = vld [vmem:[#allocation5 + $0x5a0] ss:$16 sps:$4 sm:$0xff]   ;;  %v4579_v7 = vld [vmem:[#allocation5 + $0x5a8] ss:$16 sps:$4 sm:$0xff]   ;;  %v4584_v10 = vld [vmem:[#allocation5 + $0x5c4] ss:$16 sps:$4 sm:$0xff]  }
 0x331   :  { %2662 = vmatmul.mubr.bf16.gmra.mrb[12].mxu0 %v5155_v2  ;;  %2874 = vmatmul.mubr.bf16.gmra.mrb[36].mxu1 %v5155_v2  ;;  %v4533_v2 = vld [vmem:[#allocation5 + $0x4ac] ss:$16 sps:$4 sm:$0xff]   ;;  %v4582_v12 = vld [vmem:[#allocation5 + $0x5c0] ss:$16 sps:$4 sm:$0xff]   ;;  %v4585_v13 = vld [vmem:[#allocation5 + $0x5c8] ss:$16 sps:$4 sm:$0xff]  }
 0x332   :  { %2677 = vmatpush1.bf16.msra.mxu0 %v4510_v28  ;;  %2704 = vmatprep.mubr.bf16.mxu0 %v5139_v17  ;;  %v4587_v11 = vld [vmem:[#allocation5 + $0x5cc] ss:$16 sps:$4 sm:$0xff]   ;;  %v4590_v14 = vld [vmem:[#allocation5 + $0x5e4] ss:$16 sps:$4 sm:$0xff]   ;;  %v4588_v28 = vld [vmem:[#allocation5 + $0x5e0] ss:$16 sps:$4 sm:$0xff]  }
 0x333   :  { %2889 = vmatpush1.bf16.msra.mxu1 %v4513_v18  ;;  %2916 = vmatprep.mubr.bf16.mxu1 %v5139_v17  ;;  %v4539_v17 = vld [vmem:[#allocation5 + $0x4cc] ss:$16 sps:$4 sm:$0xff]   ;;  %v4591_v18 = vld [vmem:[#allocation5 + $0x5e8] ss:$16 sps:$4 sm:$0xff]  }
 0x334   :  { %2678 = vmatprep.subr.bf16.mxu0 %v4518_v19  ;;  %2890 = vmatprep.subr.bf16.mxu1 %v4521_v3  ;;  %v4593_v15 = vld [vmem:[#allocation5 + $0x5ec] ss:$16 sps:$4 sm:$0xff]   ;;  %v4596_v19 = vld [vmem:[#allocation5 + $0x604] ss:$16 sps:$4 sm:$0xff]  }
 0x335   :  { %v4599_v3 = vld [vmem:[#allocation5 + $0x60c] ss:$16 sps:$4 sm:$0xff]  }
 0x336   :  { %2679 = vmatpush1.bf16.msra.mxu0 %v4516_v20  ;;  %v4594_v20 = vld [vmem:[#allocation5 + $0x600] ss:$16 sps:$4 sm:$0xff]  }
 0x337   :  { %2891 = vmatpush1.bf16.msra.mxu1 %v4519_v21  ;;  %2680 = vmatprep.subr.bf16.mxu0 %v4524_v45  ;;  %v4597_v21 = vld [vmem:[#allocation5 + $0x608] ss:$16 sps:$4 sm:$0xff]   ;;  %v4602_v45 = vld [vmem:[#allocation5 + $0x624] ss:$16 sps:$4 sm:$0xff]  }
 0x338   :  { %2892 = vmatprep.subr.bf16.mxu1 %v4527_v22  ;;  %v4605_v22 = vld [vmem:[#allocation5 + $0x62c] ss:$16 sps:$4 sm:$0xff]  }
 0x33a   :  { %2681 = vmatpush1.bf16.msra.mxu0 %v4522_v23  ;;  %v4600_v23 = vld [vmem:[#allocation5 + $0x620] ss:$16 sps:$4 sm:$0xff]  }
 0x33b   :  { %2893 = vmatpush1.bf16.msra.mxu1 %v4525_v24  ;;  %2682 = vmatprep.subr.bf16.mxu0 %v4530_v25  ;;  %v4603_v24 = vld [vmem:[#allocation5 + $0x628] ss:$16 sps:$4 sm:$0xff]   ;;  %v4608_v25 = vld [vmem:[#allocation5 + $0x644] ss:$16 sps:$4 sm:$0xff]  }
 0x33c   :  { %2894 = vmatprep.subr.bf16.mxu1 %v4533_v2  ;;  %v4611_v2 = vld [vmem:[#allocation5 + $0x64c] ss:$16 sps:$4 sm:$0xff]  }
 0x33e   :  { %2683 = vmatpush1.bf16.msra.mxu0 %v4528_v26  ;;  %v4606_v26 = vld [vmem:[#allocation5 + $0x640] ss:$16 sps:$4 sm:$0xff]  }
 0x33f   :  { %2895 = vmatpush1.bf16.msra.mxu1 %v4531_v27  ;;  %2684 = vmatprep.subr.bf16.mxu0 %v4536_v29  ;;  %v4609_v27 = vld [vmem:[#allocation5 + $0x648] ss:$16 sps:$4 sm:$0xff]   ;;  %v4614_v29 = vld [vmem:[#allocation5 + $0x664] ss:$16 sps:$4 sm:$0xff]  }
 0x340   :  { %2896 = vmatprep.subr.bf16.mxu1 %v4539_v17  ;;  %v4615_v17 = vld [vmem:[#allocation5 + $0x668] ss:$16 sps:$4 sm:$0xff]  }
 0x342   :  { %2685 = vmatpush1.bf16.msra.mxu0 %v4534_v30  ;;  %v4620_v30 = vld [vmem:[#allocation5 + $0x684] ss:$16 sps:$4 sm:$0xff]  }
 0x343   :  { %2897 = vmatpush1.bf16.msra.mxu1 %v4537_v31  ;;  %2686 = vmatprep.subr.bf16.mxu0 %v4542_v32  ;;  %v4623_v31 = vld [vmem:[#allocation5 + $0x68c] ss:$16 sps:$4 sm:$0xff]   ;;  %v4618_v32 = vld [vmem:[#allocation5 + $0x680] ss:$16 sps:$4 sm:$0xff]  }
 0x344   :  { %2898 = vmatprep.subr.bf16.mxu1 %v4545_v33  ;;  %v4621_v33 = vld [vmem:[#allocation5 + $0x688] ss:$16 sps:$4 sm:$0xff]  }
 0x346   :  { %2687 = vmatpush1.bf16.msra.mxu0 %v4540_v34  ;;  %v4626_v34 = vld [vmem:[#allocation5 + $0x6a4] ss:$16 sps:$4 sm:$0xff]  }
 0x347   :  { %2899 = vmatpush1.bf16.msra.mxu1 %v4543_v35  ;;  %2688 = vmatprep.subr.bf16.mxu0 %v4548_v37  ;;  %v4624_v35 = vld [vmem:[#allocation5 + $0x6a0] ss:$16 sps:$4 sm:$0xff]   ;;  %v4632_v37 = vld [vmem:[#allocation5 + $0x6c4] ss:$16 sps:$4 sm:$0xff]  }
 0x348   :  { %2900 = vmatprep.subr.bf16.mxu1 %v4551_v38  ;;  %v4635_v38 = vld [vmem:[#allocation5 + $0x6cc] ss:$16 sps:$4 sm:$0xff]  }
 0x34a   :  { %2689 = vmatpush1.bf16.msra.mxu0 %v4546_v39  ;;  %v4630_v39 = vld [vmem:[#allocation5 + $0x6c0] ss:$16 sps:$4 sm:$0xff]  }
 0x34b   :  { %2901 = vmatpush1.bf16.msra.mxu1 %v4549_v49  ;;  %2690 = vmatprep.subr.bf16.mxu0 %v4554_v40  ;;  %v4633_v49 = vld [vmem:[#allocation5 + $0x6c8] ss:$16 sps:$4 sm:$0xff]   ;;  %v4638_v40 = vld [vmem:[#allocation5 + $0x6e4] ss:$16 sps:$4 sm:$0xff]  }
 0x34c   :  { %2902 = vmatprep.subr.bf16.mxu1 %v4557_v41  ;;  %v4641_v41 = vld [vmem:[#allocation5 + $0x6ec] ss:$16 sps:$4 sm:$0xff]  }
 0x34e   :  { %2691 = vmatpush1.bf16.msra.mxu0 %v4552_v42  ;;  %v4636_v42 = vld [vmem:[#allocation5 + $0x6e0] ss:$16 sps:$4 sm:$0xff]  }
 0x34f   :  { %2903 = vmatpush1.bf16.msra.mxu1 %v4555_v43  ;;  %2692 = vmatprep.subr.bf16.mxu0 %v4560_v48  ;;  %v4639_v43 = vld [vmem:[#allocation5 + $0x6e8] ss:$16 sps:$4 sm:$0xff]   ;;  %v4644_v48 = vld [vmem:[#allocation5 + $0x704] ss:$16 sps:$4 sm:$0xff]  }
 0x350   :  { %2904 = vmatprep.subr.bf16.mxu1 %v4563_v51  ;;  %v4647_v51 = vld [vmem:[#allocation5 + $0x70c] ss:$16 sps:$4 sm:$0xff]  }
 0x352   :  { %2693 = vmatpush1.bf16.msra.mxu0 %v4558_v56  ;;  %v4642_v56 = vld [vmem:[#allocation5 + $0x700] ss:$16 sps:$4 sm:$0xff]  }
 0x353   :  { %2905 = vmatpush1.bf16.msra.mxu1 %v4561_v57  ;;  %2694 = vmatprep.subr.bf16.mxu0 %v4566_v58  ;;  %v4645_v57 = vld [vmem:[#allocation5 + $0x708] ss:$16 sps:$4 sm:$0xff]   ;;  %v4650_v58 = vld [vmem:[#allocation5 + $0x724] ss:$16 sps:$4 sm:$0xff]  }
 0x354   :  { %2906 = vmatprep.subr.bf16.mxu1 %v4569_v54  ;;  %v4653_v54 = vld [vmem:[#allocation5 + $0x72c] ss:$16 sps:$4 sm:$0xff]  }
 0x356   :  { %2695 = vmatpush1.bf16.msra.mxu0 %v4564_v60  ;;  %v4648_v60 = vld [vmem:[#allocation5 + $0x720] ss:$16 sps:$4 sm:$0xff]  }
 0x357   :  { %2907 = vmatpush1.bf16.msra.mxu1 %v4567_v61  ;;  %2696 = vmatprep.subr.bf16.mxu0 %v4572_v62  ;;  %v4651_v61 = vld [vmem:[#allocation5 + $0x728] ss:$16 sps:$4 sm:$0xff]   ;;  %v4656_v62 = vld [vmem:[#allocation5 + $0x744] ss:$16 sps:$4 sm:$0xff]  }
 0x358   :  { %2908 = vmatprep.subr.bf16.mxu1 %v4575_v63  ;;  %v4659_v63 = vld [vmem:[#allocation5 + $0x74c] ss:$16 sps:$4 sm:$0xff]  }
 0x35a   :  { %2697 = vmatpush1.bf16.msra.mxu0 %v4570_v0  ;;  %v4654_v0 = vld [vmem:[#allocation5 + $0x740] ss:$16 sps:$4 sm:$0xff]  }
 0x35b   :  { %2909 = vmatpush1.bf16.msra.mxu1 %v4573_v1  ;;  %2698 = vmatprep.subr.bf16.mxu0 %v4578_v4  ;;  %v4657_v1 = vld [vmem:[#allocation5 + $0x748] ss:$16 sps:$4 sm:$0xff]   ;;  %v4662_v4 = vld [vmem:[#allocation5 + $0x764] ss:$16 sps:$4 sm:$0xff]  }
 0x35c   :  { %2910 = vmatprep.subr.bf16.mxu1 %v4581_v5  ;;  %v4665_v5 = vld [vmem:[#allocation5 + $0x76c] ss:$16 sps:$4 sm:$0xff]  }
 0x35e   :  { %2699 = vmatpush1.bf16.msra.mxu0 %v4576_v6  ;;  %v4660_v6 = vld [vmem:[#allocation5 + $0x760] ss:$16 sps:$4 sm:$0xff]  }
 0x35f   :  { %2911 = vmatpush1.bf16.msra.mxu1 %v4579_v7  ;;  %2700 = vmatprep.subr.bf16.mxu0 %v4584_v10  ;;  %v4663_v7 = vld [vmem:[#allocation5 + $0x768] ss:$16 sps:$4 sm:$0xff]   ;;  %v4668_v10 = vld [vmem:[#allocation5 + $0x784] ss:$16 sps:$4 sm:$0xff]  }
 0x360   :  { %2912 = vmatprep.subr.bf16.mxu1 %v4587_v11  ;;  %v4671_v11 = vld [vmem:[#allocation5 + $0x78c] ss:$16 sps:$4 sm:$0xff]  }
 0x362   :  { %2701 = vmatpush1.bf16.msra.mxu0 %v4582_v12  ;;  %v4666_v12 = vld [vmem:[#allocation5 + $0x780] ss:$16 sps:$4 sm:$0xff]  }
 0x363   :  { %2913 = vmatpush1.bf16.msra.mxu1 %v4585_v13  ;;  %2702 = vmatprep.subr.bf16.mxu0 %v4590_v14  ;;  %v4669_v13 = vld [vmem:[#allocation5 + $0x788] ss:$16 sps:$4 sm:$0xff]   ;;  %v4674_v14 = vld [vmem:[#allocation5 + $0x7a4] ss:$16 sps:$4 sm:$0xff]  }
 0x364   :  { %2914 = vmatprep.subr.bf16.mxu1 %v4593_v15  ;;  %v4677_v15 = vld [vmem:[#allocation5 + $0x7ac] ss:$16 sps:$4 sm:$0xff]  }
 0x366   :  { %2703 = vmatpush1.bf16.msra.mxu0 %v4588_v28  ;;  %v4672_v28 = vld [vmem:[#allocation5 + $0x7a0] ss:$16 sps:$4 sm:$0xff]  }
 0x367   :  { %2915 = vmatpush1.bf16.msra.mxu1 %v4591_v18  ;;  %2725 = vmatprep.subr.bf16.mxu0 %v4596_v19  ;;  %v4675_v18 = vld [vmem:[#allocation5 + $0x7a8] ss:$16 sps:$4 sm:$0xff]   ;;  %v4680_v19 = vld [vmem:[#allocation5 + $0x7c4] ss:$16 sps:$4 sm:$0xff]  }
 0x368   :  { %2937 = vmatprep.subr.bf16.mxu1 %v4599_v3  ;;  %v4683_v3 = vld [vmem:[#allocation5 + $0x7cc] ss:$16 sps:$4 sm:$0xff]  }
 0x369   :  { %2705 = vmatmul.mubr.bf16.vlgmr.msra.gmra.mrb[8].mxu0 %v5137_v46 }
 0x36a   :  { %2917 = vmatmul.mubr.bf16.vlgmr.msra.gmra.mrb[32].mxu1 %v5137_v46  ;;  %2714 = vmatprep.mubr.bf16.mxu0 %v5143_v55  ;;  %v4617_v46 = vld [vmem:[#allocation5 + $0x66c] ss:$16 sps:$4 sm:$0xff]  }
 0x36b   :  { %2726 = vmatpush1.bf16.msra.mxu0 %v4594_v20  ;;  %2926 = vmatprep.mubr.bf16.mxu1 %v5143_v55  ;;  %v4612_v55 = vld [vmem:[#allocation5 + $0x660] ss:$16 sps:$4 sm:$0xff]  }
 0x36c   :  { %2938 = vmatpush1.bf16.msra.mxu1 %v4597_v21  ;;  %2727 = vmatprep.subr.bf16.mxu0 %v4602_v45  ;;  %v4678_v20 = vld [vmem:[#allocation5 + $0x7c0] ss:$16 sps:$4 sm:$0xff]   ;;  %v4681_v21 = vld [vmem:[#allocation5 + $0x7c8] ss:$16 sps:$4 sm:$0xff]   ;;  %v4686_v45 = vld [vmem:[#allocation5 + $0x7e4] ss:$16 sps:$4 sm:$0xff]  }
 0x36d   :  { %2939 = vmatprep.subr.bf16.mxu1 %v4605_v22  ;;  %v4689_v22 = vld [vmem:[#allocation5 + $0x7ec] ss:$16 sps:$4 sm:$0xff]  }
 0x36f   :  { %2728 = vmatpush1.bf16.msra.mxu0 %v4600_v23  ;;  %v4684_v23 = vld [vmem:[#allocation5 + $0x7e0] ss:$16 sps:$4 sm:$0xff]  }
 0x370   :  { %2940 = vmatpush1.bf16.msra.mxu1 %v4603_v24  ;;  %2729 = vmatprep.subr.bf16.mxu0 %v4608_v25  ;;  %v4687_v24 = vld [vmem:[#allocation5 + $0x7e8] ss:$16 sps:$4 sm:$0xff]   ;;  %v4692_v25 = vld [vmem:[#allocation7 + $0x4] ss:$8 sps:$4 sm:$0xff]  }
 0x371   :  { %2715 = vmatmul.mubr.bf16.gmra.mrb[12].mxu0 %v5141_v59  ;;  %2941 = vmatprep.subr.bf16.mxu1 %v4611_v2  ;;  %v4690_v2 = vld [vmem:[#allocation7] ss:$8 sps:$4 sm:$0xff]  }
 0x372   :  { %2927 = vmatmul.mubr.bf16.gmra.mrb[36].mxu1 %v5141_v59  ;;  %2757 = vmatprep.mubr.bf16.mxu0 %v5165_v53  ;;  %v4629_v59 = vld [vmem:[#allocation5 + $0x6ac] ss:$16 sps:$4 sm:$0xff]  }
 0x373   :  { %2730 = vmatpush1.bf16.msra.mxu0 %v4606_v26  ;;  %2969 = vmatprep.mubr.bf16.mxu1 %v5165_v53  ;;  %v4627_v53 = vld [vmem:[#allocation5 + $0x6a8] ss:$16 sps:$4 sm:$0xff]   ;;  %v4695_v26 = vld [vmem:[#allocation7 + $0x14] ss:$8 sps:$4 sm:$0xff]  }
 0x374   :  { %2942 = vmatpush1.bf16.msra.mxu1 %v4609_v27  ;;  %2731 = vmatprep.subr.bf16.mxu0 %v4614_v29  ;;  %v4693_v27 = vld [vmem:[#allocation7 + $0x10] ss:$8 sps:$4 sm:$0xff]   ;;  %v4698_v29 = vld [vmem:[#allocation7 + $0x24] ss:$8 sps:$4 sm:$0xff]  }
 0x375   :  { %2943 = vmatprep.subr.bf16.mxu1 %v4617_v46  ;;  %v4696_v46 = vld [vmem:[#allocation7 + $0x20] ss:$8 sps:$4 sm:$0xff]  }
 0x377   :  { %2732 = vmatpush1.bf16.msra.mxu0 %v4612_v55  ;;  %v4701_v55 = vld [vmem:[#allocation7 + $0x34] ss:$8 sps:$4 sm:$0xff]  }
 0x378   :  { %2944 = vmatpush1.bf16.msra.mxu1 %v4615_v17  ;;  %2733 = vmatprep.subr.bf16.mxu0 %v4620_v30  ;;  %v4699_v17 = vld [vmem:[#allocation7 + $0x30] ss:$8 sps:$4 sm:$0xff]   ;;  %v4702_v30 = vld [vmem:[#allocation7 + $0x40] ss:$8 sps:$4 sm:$0xff]  }
 0x379   :  { %2945 = vmatprep.subr.bf16.mxu1 %v4623_v31  ;;  %v4705_v31 = vld [vmem:[#allocation7 + $0x50] ss:$8 sps:$4 sm:$0xff]  }
 0x37b   :  { %2734 = vmatpush1.bf16.msra.mxu0 %v4618_v32  ;;  %v4710_v32 = vld [vmem:[#allocation7 + $0x64] ss:$8 sps:$4 sm:$0xff]  }
 0x37c   :  { %2946 = vmatpush1.bf16.msra.mxu1 %v4621_v33  ;;  %2735 = vmatprep.subr.bf16.mxu0 %v4626_v34  ;;  %v4708_v33 = vld [vmem:[#allocation7 + $0x60] ss:$8 sps:$4 sm:$0xff]   ;;  %v4713_v34 = vld [vmem:[#allocation7 + $0x74] ss:$8 sps:$4 sm:$0xff]  }
 0x37d   :  { %2947 = vmatprep.subr.bf16.mxu1 %v4629_v59  ;;  %v4711_v59 = vld [vmem:[#allocation7 + $0x70] ss:$8 sps:$4 sm:$0xff]  }
 0x37f   :  { %2736 = vmatpush1.bf16.msra.mxu0 %v4624_v35  ;;  %v4714_v35 = vld [vmem:[#allocation7 + $0x80] ss:$8 sps:$4 sm:$0xff]  }
 0x380   :  { %2948 = vmatpush1.bf16.msra.mxu1 %v4627_v53  ;;  %2737 = vmatprep.subr.bf16.mxu0 %v4632_v37  ;;  %v4719_v53 = vld [vmem:[#allocation7 + $0x94] ss:$8 sps:$4 sm:$0xff]   ;;  %v4717_v37 = vld [vmem:[#allocation7 + $0x90] ss:$8 sps:$4 sm:$0xff]  }
 0x381   :  { %2949 = vmatprep.subr.bf16.mxu1 %v4635_v38  ;;  %v4722_v38 = vld [vmem:[#allocation7 + $0xa4] ss:$8 sps:$4 sm:$0xff]  }
 0x383   :  { %2738 = vmatpush1.bf16.msra.mxu0 %v4630_v39  ;;  %v4720_v39 = vld [vmem:[#allocation7 + $0xa0] ss:$8 sps:$4 sm:$0xff]  }
 0x384   :  { %2950 = vmatpush1.bf16.msra.mxu1 %v4633_v49  ;;  %2739 = vmatprep.subr.bf16.mxu0 %v4638_v40  ;;  %v4725_v49 = vld [vmem:[#allocation7 + $0xb4] ss:$8 sps:$4 sm:$0xff]   ;;  %v4723_v40 = vld [vmem:[#allocation7 + $0xb0] ss:$8 sps:$4 sm:$0xff]  }
 0x385   :  { %2951 = vmatprep.subr.bf16.mxu1 %v4641_v41  ;;  %v4728_v41 = vld [vmem:[#allocation7 + $0xc4] ss:$8 sps:$4 sm:$0xff]  }
 0x387   :  { %2740 = vmatpush1.bf16.msra.mxu0 %v4636_v42  ;;  %v4726_v42 = vld [vmem:[#allocation7 + $0xc0] ss:$8 sps:$4 sm:$0xff]  }
 0x388   :  { %2952 = vmatpush1.bf16.msra.mxu1 %v4639_v43  ;;  %2741 = vmatprep.subr.bf16.mxu0 %v4644_v48  ;;  %v4731_v43 = vld [vmem:[#allocation7 + $0xd4] ss:$8 sps:$4 sm:$0xff]   ;;  %v4729_v48 = vld [vmem:[#allocation7 + $0xd0] ss:$8 sps:$4 sm:$0xff]  }
 0x389   :  { %2953 = vmatprep.subr.bf16.mxu1 %v4647_v51  ;;  %v4734_v51 = vld [vmem:[#allocation7 + $0xe4] ss:$8 sps:$4 sm:$0xff]  }
 0x38b   :  { %2742 = vmatpush1.bf16.msra.mxu0 %v4642_v56  ;;  %v4732_v56 = vld [vmem:[#allocation7 + $0xe0] ss:$8 sps:$4 sm:$0xff]  }
 0x38c   :  { %2954 = vmatpush1.bf16.msra.mxu1 %v4645_v57  ;;  %2743 = vmatprep.subr.bf16.mxu0 %v4650_v58  ;;  %v4737_v57 = vld [vmem:[#allocation7 + $0xf4] ss:$8 sps:$4 sm:$0xff]   ;;  %v4735_v58 = vld [vmem:[#allocation7 + $0xf0] ss:$8 sps:$4 sm:$0xff]  }
 0x38d   :  { %2955 = vmatprep.subr.bf16.mxu1 %v4653_v54  ;;  %v4740_v54 = vld [vmem:[#allocation7 + $0x104] ss:$8 sps:$4 sm:$0xff]  }
 0x38f   :  { %2744 = vmatpush1.bf16.msra.mxu0 %v4648_v60  ;;  %v4786_v60 = vld [vmem:[#allocation8 + $0x40] sm:$0xff]  }
 0x390   :  { %2956 = vmatpush1.bf16.msra.mxu1 %v4651_v61  ;;  %2745 = vmatprep.subr.bf16.mxu0 %v4656_v62  ;;  %v4787_v61 = vld [vmem:[#allocation8] sm:$0xff]   ;;  %v4788_v62 = vld [vmem:[#allocation8 + $0x48] sm:$0xff]  }
 0x391   :  { %2957 = vmatprep.subr.bf16.mxu1 %v4659_v63  ;;  %v4789_v63 = vld [vmem:[#allocation8 + $0x8] sm:$0xff]  }
 0x393   :  { %2746 = vmatpush1.bf16.msra.mxu0 %v4654_v0  ;;  %v4790_v0 = vld [vmem:[#allocation8 + $0x50] sm:$0xff]  }
 0x394   :  { %2958 = vmatpush1.bf16.msra.mxu1 %v4657_v1  ;;  %2747 = vmatprep.subr.bf16.mxu0 %v4662_v4  ;;  %v4791_v1 = vld [vmem:[#allocation8 + $0x10] sm:$0xff]   ;;  %v4792_v4 = vld [vmem:[#allocation8 + $0x58] sm:$0xff]  }
 0x395   :  { %2959 = vmatprep.subr.bf16.mxu1 %v4665_v5  ;;  %v4793_v5 = vld [vmem:[#allocation8 + $0x18] sm:$0xff]  }
 0x397   :  { %2748 = vmatpush1.bf16.msra.mxu0 %v4660_v6  ;;  %v4794_v6 = vld [vmem:[#allocation8 + $0x60] sm:$0xff]  }
 0x398   :  { %2960 = vmatpush1.bf16.msra.mxu1 %v4663_v7  ;;  %2749 = vmatprep.subr.bf16.mxu0 %v4668_v10  ;;  %v4795_v7 = vld [vmem:[#allocation8 + $0x20] sm:$0xff]   ;;  %v4796_v10 = vld [vmem:[#allocation8 + $0x68] sm:$0xff]  }
 0x399   :  { %2961 = vmatprep.subr.bf16.mxu1 %v4671_v11  ;;  %v1264_v11 = vld [vmem:[%s5241_s10] sm:$0xf] }
 0x39b   :  { %2750 = vmatpush1.bf16.msra.mxu0 %v4666_v12  ;;  %v1269_v12 = vrot.slane %v1264_v11, %v5119_v47 }
 0x39c   :  { %2962 = vmatpush1.bf16.msra.mxu1 %v4669_v13  ;;  %2751 = vmatprep.subr.bf16.mxu0 %v4674_v14  ;;  %v1277_v13 = vrot.slane %v1264_v11, %v398_v8  ;;  %v1273_v14 = vrot.slane %v1264_v11, %v5128_v50 }
 0x39d   :  { %2963 = vmatprep.subr.bf16.mxu1 %v4677_v15  ;;  %v1281_v15 = vrot.slane %v1264_v11, %v402_v9 }
 0x39f   :  { %2752 = vmatpush1.bf16.msra.mxu0 %v4672_v28 }
 0x3a0   :  { %2964 = vmatpush1.bf16.msra.mxu1 %v4675_v18  ;;  %2753 = vmatprep.subr.bf16.mxu0 %v4680_v19 }
 0x3a1   :  { %2965 = vmatprep.subr.bf16.mxu1 %v4683_v3 }
 0x3a3   :  { %2754 = vmatpush1.bf16.msra.mxu0 %v4678_v20 }
 0x3a4   :  { %2966 = vmatpush1.bf16.msra.mxu1 %v4681_v21  ;;  %2755 = vmatprep.subr.bf16.mxu0 %v4686_v45 }
 0x3a5   :  { %2967 = vmatprep.subr.bf16.mxu1 %v4689_v22 }
 0x3a7   :  { %2756 = vmatpush1.bf16.msra.mxu0 %v4684_v23 }
 0x3a8   :  { %2968 = vmatpush1.bf16.msra.mxu1 %v4687_v24  ;;  %3410 = vmatprep.subr.bf16.mxu0 %v4692_v25 }
 0x3a9   :  { %4160 = vmatprep.subr.bf16.mxu1 %v4786_v60 }
 0x3aa   :  { %2758 = vmatmul.mubr.bf16.vlgmr.msra.gmra.mrb[8].mxu0 %v5163_v52 }
 0x3ab   :  { %2970 = vmatmul.mubr.bf16.vlgmr.msra.gmra.mrb[32].mxu1 %v5163_v52  ;;  %2767 = vmatprep.mubr.bf16.mxu0 %v5173_v36  ;;  %v4704_v52 = vld [vmem:[#allocation7 + $0x44] ss:$8 sps:$4 sm:$0xff]  }
 0x3ac   :  { %2979 = vmatprep.mubr.bf16.mxu1 %v5173_v36  ;;  %3411 = vmatpush1.bf16.msra.mxu0 %v4690_v2  ;;  %v4707_v36 = vld [vmem:[#allocation7 + $0x54] ss:$8 sps:$4 sm:$0xff]  }
 0x3ad   :  { %3412 = vmatprep.subr.bf16.mxu0 %v4695_v26  ;;  %4161 = vmatpush3.bf16.msra.mxu1 %v4787_v61 }
 0x3ae   :  { %4162 = vmatprep.subr.bf16.mxu1 %v4788_v62 }
 0x3b0   :  { %3413 = vmatpush1.bf16.msra.mxu0 %v4693_v27 }
 0x3b1   :  { %3414 = vmatprep.subr.bf16.mxu0 %v4698_v29  ;;  %4163 = vmatpush3.bf16.msra.mxu1 %v4789_v63  ;;  %v4746_v63 = vld [vmem:[#allocation7 + $0x124] ss:$8 sps:$4 sm:$0xff]  }
 0x3b2   :  { %2768 = vmatmul.mubr.bf16.gmra.mrb[12].mxu0 %v5171_v16  ;;  %4164 = vmatprep.subr.bf16.mxu1 %v4790_v0 }
 0x3b3   :  { %2980 = vmatmul.mubr.bf16.gmra.mrb[36].mxu1 %v5171_v16  ;;  %v4716_v16 = vld [vmem:[#allocation7 + $0x84] ss:$8 sps:$4 sm:$0xff]  }
 0x3b4   :  { %3415 = vmatpush1.bf16.msra.mxu0 %v4696_v46 }
 0x3b5   :  { %3416 = vmatprep.subr.bf16.mxu0 %v4701_v55  ;;  %4165 = vmatpush3.bf16.msra.mxu1 %v4791_v1 }
 0x3b6   :  { %4166 = vmatprep.subr.bf16.mxu1 %v4792_v4 }
 0x3b8   :  { %3417 = vmatpush1.bf16.msra.mxu0 %v4699_v17 }
 0x3b9   :  { %3418 = vmatprep.subr.bf16.mxu0 %v4704_v52  ;;  %4167 = vmatpush3.bf16.msra.mxu1 %v4793_v5 }
 0x3ba   :  { %4168 = vmatprep.subr.bf16.mxu1 %v4794_v6 }
 0x3bc   :  { %3419 = vmatpush1.bf16.msra.mxu0 %v4702_v30 }
 0x3bd   :  { %3420 = vmatprep.subr.bf16.mxu0 %v4707_v36  ;;  %4169 = vmatpush3.bf16.msra.mxu1 %v4795_v7 }
 0x3be   :  { %4170 = vmatprep.subr.bf16.mxu1 %v4796_v10 }
 0x3c0   :  { %3421 = vmatpush1.bf16.msra.mxu0 %v4705_v31 }
 0x3c1   :  { %3422 = vmatprep.subr.bf16.mxu0 %v4710_v32 }
 0x3c4   :  { %3423 = vmatpush1.bf16.msra.mxu0 %v4708_v33 }
 0x3c5   :  { %3424 = vmatprep.subr.bf16.mxu0 %v4713_v34 }
 0x3c8   :  { %3425 = vmatpush1.bf16.msra.mxu0 %v4711_v59  ;;  %v4738_v59 = vld [vmem:[#allocation7 + $0x100] ss:$8 sps:$4 sm:$0xff]  }
 0x3c9   :  { %3426 = vmatprep.subr.bf16.mxu0 %v4716_v16 }
 0x3cc   :  { %3427 = vmatpush1.bf16.msra.mxu0 %v4714_v35 }
 0x3cd   :  { %3428 = vmatprep.subr.bf16.mxu0 %v4719_v53 }
 0x3d0   :  { %3429 = vmatpush1.bf16.msra.mxu0 %v4717_v37 }
 0x3d1   :  { %3430 = vmatprep.subr.bf16.mxu0 %v4722_v38  ;;  %v4743_v38 = vld [vmem:[#allocation7 + $0x114] ss:$8 sps:$4 sm:$0xff]  }
 0x3d4   :  { %3431 = vmatpush1.bf16.msra.mxu0 %v4720_v39 }
 0x3d5   :  { %3432 = vmatprep.subr.bf16.mxu0 %v4725_v49 }
 0x3d8   :  { %3433 = vmatpush1.bf16.msra.mxu0 %v4723_v40 }
 0x3d9   :  { %3434 = vmatprep.subr.bf16.mxu0 %v4728_v41 }
 0x3dc   :  { %3435 = vmatpush1.bf16.msra.mxu0 %v4726_v42 }
 0x3dd   :  { %3436 = vmatprep.subr.bf16.mxu0 %v4731_v43 }
 0x3e0   :  { %3437 = vmatpush1.bf16.msra.mxu0 %v4729_v48 }
 0x3e1   :  { %3438 = vmatprep.subr.bf16.mxu0 %v4734_v51 }
 0x3e4   :  { %3439 = vmatpush1.bf16.msra.mxu0 %v4732_v56 }
 0x3e5   :  { %3440 = vmatprep.subr.bf16.mxu0 %v4737_v57 }
 0x3e8   :  { %3441 = vmatpush1.bf16.msra.mxu0 %v4735_v58 }
 0x3e9   :  { %3463 = vmatprep.subr.bf16.mxu0 %v4740_v54  ;;  %v4741_v54 = vld [vmem:[#allocation7 + $0x110] ss:$8 sps:$4 sm:$0xff]  }
 0x47d   :  { %v2759_v28 = vpop.f32.mrb[8].mxu0 }
 0x47e   :  { %v4208_v18 = vadd.f32 %v2759_v28, %v1269_v12  ;;  %v2971_v19 = vpop.f32.mrb[32].mxu1  ;;  %v2761_v3 = vpop.f32.mrb[9].mxu0  ;;  %v4749_v28 = vld [vmem:[#allocation7 + $0x134] ss:$8 sps:$4 sm:$0xff]  }
 0x47f   :  { %v4216_v20 = vadd.f32 %v2971_v19, %v1277_v13  ;;  %v4209_v21 = vadd.f32 %v2761_v3, %v1273_v14  ;;  %v2973_v45 = vpop.f32.mrb[33].mxu1  ;;  %v2763_v22 = vpop.f32.mrb[10].mxu0  ;;  %v4750_v19 = vld [vmem:[#allocation7 + $0x140] ss:$8 sps:$4 sm:$0xff]   ;;  %v4755_v3 = vld [vmem:[#allocation7 + $0x154] ss:$8 sps:$4 sm:$0xff]  }
 0x480   :  { %v4217_v23 = vadd.f32 %v2973_v45, %v1281_v15  ;;  %v4210_v24 = vadd.f32 %v2763_v22, %v1269_v12  ;;  %v2975_v25 = vpop.f32.mrb[34].mxu1  ;;  %v2765_v2 = vpop.f32.mrb[11].mxu0  ;;  %v2990_v29 = vmax.f32 %v4208_v18, 0.0  ;;  %v4752_v18 = vld [vmem:[#allocation7 + $0x144] ss:$8 sps:$4 sm:$0xff]  }
 0x481   :  { %v4218_v26 = vadd.f32 %v2975_v25, %v1277_v13  ;;  %v4211_v27 = vadd.f32 %v2765_v2, %v1273_v14  ;;  %v2977_v8 = vpop.f32.mrb[35].mxu1  ;;  %v2992_v44 = vmax.f32 %v4216_v20, 0.0  ;;  %v2991_v9 = vmax.f32 %v4209_v21, 0.0  ;;  %v4753_v20 = vld [vmem:[#allocation7 + $0x150] ss:$8 sps:$4 sm:$0xff]  }
 0x482   :  { %v2994_v46 = vmax.f32 %v4210_v24, 0.0  ;;  %v4219_v55 = vadd.f32 %v2977_v8, %v1281_v15  ;;  %v2993_v30 = vmax.f32 %v4217_v23, 0.0  ;;  %v4758_v21 = vld [vmem:[#allocation7 + $0x164] ss:$8 sps:$4 sm:$0xff]   ;;  %v4756_v45 = vld [vmem:[#allocation7 + $0x160] ss:$8 sps:$4 sm:$0xff]  }
 0x483   :  { %v2996_v17 = vmax.f32 %v4218_v26, 0.0  ;;  %v2995_v52 = vmax.f32 %v4211_v27, 0.0  ;;  %v4761_v22 = vld [vmem:[#allocation7 + $0x174] ss:$8 sps:$4 sm:$0xff]   ;;  %v4759_v23 = vld [vmem:[#allocation7 + $0x170] ss:$8 sps:$4 sm:$0xff]  }
 0x484   :  { %v3006_v36 = vpack.c.bf16 %v2994_v46, %v2990_v29  ;;  %v2997_v31 = vmax.f32 %v4219_v55, 0.0  ;;  %v4764_v24 = vld [vmem:[#allocation7 + $0x184] ss:$8 sps:$4 sm:$0xff]   ;;  %v4762_v25 = vld [vmem:[#allocation7 + $0x180] ss:$8 sps:$4 sm:$0xff]  }
 0x485   :  { %v5202_v32 = vpack.c.bf16 %v2996_v17, %v2992_v44  ;;  %v3007_v33 = vpack.c.bf16 %v2995_v52, %v2991_v9  ;;  %v2769_v34 = vpop.f32.mrb[12].mxu0  ;;  %v4767_v2 = vld [vmem:[#allocation7 + $0x194] ss:$8 sps:$4 sm:$0xff]   ;;  %v4765_v26 = vld [vmem:[#allocation7 + $0x190] ss:$8 sps:$4 sm:$0xff]  }
 0x486   :  { %v3009_v16 = vpack.c.bf16 %v2997_v31, %v2993_v30  ;;  %v4212_v35 = vadd.f32 %v2769_v34, %v1269_v12  ;;  %v2981_v53 = vpop.f32.mrb[36].mxu1  ;;  %v2771_v37 = vpop.f32.mrb[13].mxu0  ;;  %v4770_v27 = vld [vmem:[#allocation7 + $0x1a4] ss:$8 sps:$4 sm:$0xff]   ;;  %v4768_v8 = vld [vmem:[#allocation7 + $0x1a0] ss:$8 sps:$4 sm:$0xff]  }
 0x487   :  { %v4220_v39 = vadd.f32 %v2981_v53, %v1277_v13  ;;  %v4213_v49 = vadd.f32 %v2771_v37, %v1273_v14  ;;  %v2983_v40 = vpop.f32.mrb[37].mxu1  ;;  %v2773_v41 = vpop.f32.mrb[14].mxu0  ;;  %3442 = vmatprep.mubr.bf16.mxu0 %v3007_v33  ;;  %v4773_v29 = vld [vmem:[#allocation7 + $0x1b4] ss:$8 sps:$4 sm:$0xff]   ;;  %v4771_v46 = vld [vmem:[#allocation7 + $0x1b0] ss:$8 sps:$4 sm:$0xff]  }
 0x488   :  { %v4221_v42 = vadd.f32 %v2983_v40, %v1281_v15  ;;  %v4214_v43 = vadd.f32 %v2773_v41, %v1269_v12  ;;  %v2985_v48 = vpop.f32.mrb[38].mxu1  ;;  %v2775_v51 = vpop.f32.mrb[15].mxu0  ;;  %3443 = vmatmul.mubr.bf16.vlgmr.msra.gmra.mrb[16].mxu0 %v3006_v36  ;;  %v2998_v60 = vmax.f32 %v4212_v35, 0.0  ;;  %v4776_v55 = vld [vmem:[#allocation7 + $0x1c4] ss:$8 sps:$4 sm:$0xff]   ;;  %v4798_v34 = vld [vmem:[#allocation8 + $0x70] sm:$0xff]  }
 0x489   :  { %v4222_v56 = vadd.f32 %v2985_v48, %v1277_v13  ;;  %v4215_v57 = vadd.f32 %v2775_v51, %v1273_v14  ;;  %v2987_v58 = vpop.f32.mrb[39].mxu1  ;;  %3464 = vmatpush1.bf16.msra.mxu0 %v4738_v59  ;;  %v3000_v0 = vmax.f32 %v4220_v39, 0.0  ;;  %v2999_v1 = vmax.f32 %v4213_v49, 0.0  ;;  %v4744_v13 = vld [vmem:[#allocation7 + $0x120] ss:$8 sps:$4 sm:$0xff]   ;;  %v4799_v59 = vld [vmem:[#allocation8 + $0x30] sm:$0xff]  }
 0x48a   :  { %v3002_v61 = vmax.f32 %v4214_v43, 0.0  ;;  %v4223_v62 = vadd.f32 %v2987_v58, %v1281_v15  ;;  %3465 = vmatprep.subr.bf16.mxu0 %v4743_v38  ;;  %v3001_v6 = vmax.f32 %v4221_v42, 0.0  ;;  %v4747_v15 = vld [vmem:[#allocation7 + $0x130] ss:$8 sps:$4 sm:$0xff]   ;;  %v4774_v44 = vld [vmem:[#allocation7 + $0x1c0] ss:$8 sps:$4 sm:$0xff]  }
 0x48b   :  { %v3004_v4 = vmax.f32 %v4222_v56, 0.0  ;;  %v3003_v5 = vmax.f32 %v4215_v57, 0.0  ;;  %v4779_v9 = vld [vmem:[#allocation7 + $0x1d4] ss:$8 sps:$4 sm:$0xff]   ;;  %v4777_v17 = vld [vmem:[#allocation7 + $0x1d0] ss:$8 sps:$4 sm:$0xff]  }
 0x48c   :  { %v3010_v7 = vpack.c.bf16 %v3002_v61, %v2998_v60  ;;  %v3005_v10 = vmax.f32 %v4223_v62, 0.0  ;;  %v4782_v52 = vld [vmem:[#allocation7 + $0x1e4] ss:$8 sps:$4 sm:$0xff]   ;;  %v4780_v30 = vld [vmem:[#allocation7 + $0x1e0] ss:$8 sps:$4 sm:$0xff]   ;;  %v4801_v35 = vld [vmem:[#allocation8 + $0x38] sm:$0xff]  }
 0x48d   :  { %v5204_v11 = vpack.c.bf16 %v3004_v4, %v3000_v0  ;;  %v3011_v12 = vpack.c.bf16 %v3003_v5, %v2999_v1  ;;  %3466 = vmatpush1.bf16.msra.mxu0 %v4741_v54  ;;  %v4785_v36 = vld [vmem:[#allocation7 + $0x1f4] ss:$8 sps:$4 sm:$0xff]   ;;  %v4783_v31 = vld [vmem:[#allocation7 + $0x1f0] ss:$8 sps:$4 sm:$0xff]   ;;  %v4797_v33 = vld [vmem:[#allocation8 + $0x28] sm:$0xff]  }
 0x48e   :  { %v3013_v14 = vpack.c.bf16 %v3005_v10, %v3001_v6  ;;  %3467 = vmatprep.subr.bf16.mxu0 %v4746_v63  ;;  %4171 = vmatpush3.bf16.msra.mxu1 %v4797_v33  ;;  %v3078_v53 = vld [vmem:[%s5242_s11] sm:$0x3] }
 0x48f   :  { %3452 = vmatprep.mubr.bf16.mxu0 %v3011_v12  ;;  %4172 = vmatprep.subr.bf16.mxu1 %v4798_v34  ;;  %v3083_v37 = vrot.slane %v3078_v53, %v5119_v47 }
 0x490   :  { %3453 = vmatmul.mubr.bf16.gmra.mrb[20].mxu0 %v3010_v7 }
 0x491   :  { %3468 = vmatpush1.bf16.msra.mxu0 %v4744_v13  ;;  %3495 = vmatprep.mubr.bf16.mxu0 %v3009_v16  ;;  %v4800_v16 = vld [vmem:[#allocation8 + $0x78] sm:$0xff]  }
 0x492   :  { %3469 = vmatprep.subr.bf16.mxu0 %v4749_v28  ;;  %4173 = vmatpush3.bf16.msra.mxu1 %v4799_v59 }
 0x493   :  { %4174 = vmatprep.subr.bf16.mxu1 %v4800_v16 }
 0x495   :  { %3470 = vmatpush1.bf16.msra.mxu0 %v4747_v15 }
 0x496   :  { %3471 = vmatprep.subr.bf16.mxu0 %v4752_v18  ;;  %4175 = vmatpush3.bf16.msra.mxu1 %v4801_v35 }
 0x499   :  { %3472 = vmatpush1.bf16.msra.mxu0 %v4750_v19 }
 0x49a   :  { %3473 = vmatprep.subr.bf16.mxu0 %v4755_v3 }
 0x49d   :  { %3474 = vmatpush1.bf16.msra.mxu0 %v4753_v20 }
 0x49e   :  { %3475 = vmatprep.subr.bf16.mxu0 %v4758_v21 }
 0x4a1   :  { %3476 = vmatpush1.bf16.msra.mxu0 %v4756_v45 }
 0x4a2   :  { %3477 = vmatprep.subr.bf16.mxu0 %v4761_v22 }
 0x4a5   :  { %3478 = vmatpush1.bf16.msra.mxu0 %v4759_v23 }
 0x4a6   :  { %3479 = vmatprep.subr.bf16.mxu0 %v4764_v24 }
 0x4a9   :  { %3480 = vmatpush1.bf16.msra.mxu0 %v4762_v25 }
 0x4aa   :  { %3481 = vmatprep.subr.bf16.mxu0 %v4767_v2 }
 0x4ad   :  { %3482 = vmatpush1.bf16.msra.mxu0 %v4765_v26 }
 0x4ae   :  { %3483 = vmatprep.subr.bf16.mxu0 %v4770_v27 }
 0x4b1   :  { %3484 = vmatpush1.bf16.msra.mxu0 %v4768_v8 }
 0x4b2   :  { %3485 = vmatprep.subr.bf16.mxu0 %v4773_v29 }
 0x4b5   :  { %3486 = vmatpush1.bf16.msra.mxu0 %v4771_v46 }
 0x4b6   :  { %3487 = vmatprep.subr.bf16.mxu0 %v4776_v55 }
 0x4b9   :  { %3488 = vmatpush1.bf16.msra.mxu0 %v4774_v44 }
 0x4ba   :  { %3489 = vmatprep.subr.bf16.mxu0 %v4779_v9 }
 0x4bd   :  { %3490 = vmatpush1.bf16.msra.mxu0 %v4777_v17 }
 0x4be   :  { %3491 = vmatprep.subr.bf16.mxu0 %v4782_v52 }
 0x4c1   :  { %3492 = vmatpush1.bf16.msra.mxu0 %v4780_v30 }
 0x4c2   :  { %3493 = vmatprep.subr.bf16.mxu0 %v4785_v36 }
 0x4c5   :  { %3494 = vmatpush1.bf16.msra.mxu0 %v4783_v31 }
 0x4c8   :  { %3496 = vmatmul.mubr.bf16.vlgmr.msra.gmra.mrb[16].mxu0 %v5202_v32  ;;  %v3087_v32 = vrot.slane %v3078_v53, %v5128_v50 }
 0x4c9   :  { %3505 = vmatprep.mubr.bf16.mxu0 %v3013_v14  ;;  %v4132_v14 = vld [vmem:[%s5243_s12] ss:$0 sm:$0xff]  ;;  %s4890_s12 = scalar_lea.vmem %s3722_s15, 512 }
 0x4ca   :  { %p4891_p4 = scmp.ne.s32.totalorder %s3722_s15, %s4890_s12  ;;  %p4896_p6 = scmp.lt.s32.totalorder %s4890_s12, %s4890_s12 }
 0x4cc   :  { %p4897_p7 = por %p4896_p6, %p4895_p5 }
 0x4ce   :  { %p4898_p8 = pnand %p4897_p7, %p4891_p4 }
 0x4d0   :  { %3506 = vmatmul.mubr.bf16.gmra.mrb[20].mxu0 %v5204_v11 }
 0x59b   :  { %v3497_v38 = vpop.f32.mrb[16].mxu0 }
 0x59c   :  { %v4224_v39 = vadd.f32 %v3497_v38, %v3083_v37  ;;  %v3499_v49 = vpop.f32.mrb[17].mxu0 }
 0x59d   :  { %v4225_v40 = vadd.f32 %v3499_v49, %v3087_v32  ;;  %v3501_v41 = vpop.f32.mrb[18].mxu0 }
 0x59e   :  { %v4226_v42 = vadd.f32 %v3501_v41, %v3083_v37  ;;  %v3503_v43 = vpop.f32.mrb[19].mxu0  ;;  %v3516_v51 = vmax.f32 %v4224_v39, 0.0 }
 0x59f   :  { %v4227_v48 = vadd.f32 %v3503_v43, %v3087_v32  ;;  %v3517_v57 = vmax.f32 %v4225_v40, 0.0 }
 0x5a0   :  { %v3518_v56 = vmax.f32 %v4226_v42, 0.0 }
 0x5a1   :  { %v3519_v58 = vmax.f32 %v4227_v48, 0.0 }
 0x5a2   :  { %v3524_v54 = vpack.c.bf16 %v3518_v56, %v3516_v51 }
 0x5a3   :  { %v3525_v60 = vpack.c.bf16 %v3519_v58, %v3517_v57  ;;  %v3507_v61 = vpop.f32.mrb[20].mxu0 }
 0x5a4   :  { %v4228_v62 = vadd.f32 %v3507_v61, %v3083_v37  ;;  %v3509_v63 = vpop.f32.mrb[21].mxu0 }
 0x5a5   :  { %v4229_v47 = vadd.f32 %v3509_v63, %v3087_v32  ;;  %v3511_v0 = vpop.f32.mrb[22].mxu0  ;;  %3695 = vmatprep.mubr.bf16.mxu1 %v3525_v60 }
 0x5a6   :  { %v4230_v50 = vadd.f32 %v3511_v0, %v3083_v37  ;;  %v3513_v1 = vpop.f32.mrb[23].mxu0  ;;  %3696 = vmatmul.mubr.bf16.vlgmr.msra.gmra.mrb[40].mxu1 %v3524_v54  ;;  %v3520_v5 = vmax.f32 %v4228_v62, 0.0 }
 0x5a7   :  { %v4231_v4 = vadd.f32 %v3513_v1, %v3087_v32  ;;  %v3521_v7 = vmax.f32 %v4229_v47, 0.0 }
 0x5a8   :  { %v3522_v6 = vmax.f32 %v4230_v50, 0.0 }
 0x5a9   :  { %v3523_v10 = vmax.f32 %v4231_v4, 0.0 }
 0x5aa   :  { %v3526_v11 = vpack.c.bf16 %v3522_v6, %v3520_v5 }
 0x5ab   :  { %v3527_v12 = vpack.c.bf16 %v3523_v10, %v3521_v7 }
 0x5ad   :  { %3703 = vmatprep.mubr.bf16.mxu1 %v3527_v12 }
 0x5ae   :  { %3704 = vmatmul.mubr.bf16.gmra.mrb[44].mxu1 %v3526_v11 }
 0x679   :  { %v4176_v13 = vpop.f32.mrb[40].mxu1 }
 0x67a   :  { %v4177_v28 = vpop.f32.mrb[41].mxu1 }
 0x67b   :  { %v4178_v15 = vadd.f32 %v4177_v28, %v4176_v13  ;;  %v4179_v18 = vpop.f32.mrb[42].mxu1 }
 0x67c   :  { %v4180_v19 = vpop.f32.mrb[43].mxu1 }
 0x67d   :  { %v3698_v3 = vadd.f32 %v4178_v15, %v4132_v14  ;;  %v4181_v20 = vadd.f32 %v4180_v19, %v4179_v18 }
 0x67f   :  { %3712 = vst [vmem:[#allocation10] sm:$0xff] %v3698_v3  ;;  %v3701_v21 = vadd.f32 %v4181_v20, %v4132_v14 }
 0x681   :  { %3713 = vst [vmem:[#allocation10 + $0x8] sm:$0xff] %v3701_v21  ;;  %v4182_v45 = vpop.f32.mrb[44].mxu1 }
 0x682   :  { %v4183_v22 = vpop.f32.mrb[45].mxu1 }
 0x683   :  { %v4184_v23 = vadd.f32 %v4183_v22, %v4182_v45  ;;  %v4185_v24 = vpop.f32.mrb[46].mxu1 }
 0x684   :  { %v4186_v25 = vpop.f32.mrb[47].mxu1 }
 0x685   :  { %v3706_v2 = vadd.f32 %v4184_v23, %v4132_v14  ;;  %v4187_v26 = vadd.f32 %v4186_v25, %v4185_v24 }
 0x687   :  { %3714 = vst [vmem:[#allocation10 + $0x10] sm:$0xff] %v3706_v2  ;;  %v3709_v27 = vadd.f32 %v4187_v26, %v4132_v14 }
 0x689   :  { %3715 = vst [vmem:[#allocation10 + $0x18] sm:$0xff] %v3709_v27 }
 0x68a   :  { %4901 = shalt.err (!%p4898_p8)
}
 0x68b   :  { %s4902_s4 = scalar_lea.hbm %s5244_s13, 512 }
 0x68c   :  { %p4903_p9 = scmp.ne.s32.totalorder %s5244_s13, %s4902_s4  ;;  %p4906_p10 = scmp.lt.u32.totalorder %s4902_s4, %s5244_s13 }
 0x68e   :  { %p4908_p11 = pnand %p4906_p10, %p4903_p9 }
 0x690   :  { %4911 = shalt.err (!%p4908_p11)
}
 0x691   :  { %3727 = dma.vmem_to_hbm [thread:$0]  %s3722_s15, 512, %s5244_s13, [#allocation4], %s4927_s3, %s4927_s3, %s4928_s23  }
 0x692   :  { %4918 = dma.done.wait [#allocation4], 512  }
 0x693   :  { %4919 = vsyncadd [#allocation4], 4294966784 }
 0x694   :  { %3731 = vsyncpa [#allocation3], 1 }
 0x695   :  { %3732 = vsyncpa [#allocation6], 1 }
 0x696   :  { %3733 = vsyncpa [#allocation9], 1 }
 0x697   :  { %3734 = vsyncpa [#allocation4], 1 }

</bundles_post_ra>
